<compile_context>
chip_gen: v7x
topology: tpu7x:2x2x1
jax: 0.10.0
libtpu: 0.0.40
codegen_flags: <defaults>
</compile_context>

<pallas_src>
import functools

import jax
import jax.numpy as jnp
from jax.experimental import pallas as pl
from jax.experimental.pallas import tpu as pltpu


def lstm_ae_kernel(x_ref,          # (T, B, Dx)   f32, time-major
                   wih_e_ref,      # (Dx, 4H)     encoder input weights (transposed)
                   whh_e_ref,      # (4H, 4H)     encoder recurrent weights, rows [H:4H] zero
                   be_ref,         # (1, 4H)      encoder bias (b_ih + b_hh), f32
                   wih_d_ref,      # (4H, 4H)     decoder input weights, rows [H:4H] zero
                   whh_d_ref,      # (4H, 4H)     decoder recurrent weights, rows [H:4H] zero
                   bd_ref,         # (1, 4H)      decoder bias, f32
                   wo_ref,         # (4H, Dp)     output projection, rows [H:4H] / cols [Dx:Dp] zero
                   bo_ref,         # (1, Dp)      output bias, cols [Dx:Dp] zero
                   out_ref):       # (T, B, Dp)   f32 reconstruction (lane-dense, Dp>=128)
    T, B, Dx = x_ref.shape
    G = whh_e_ref.shape[0]          # 4H
    H = G // 4

    # ---- batched encoder input projection: ONE MXU matmul, bias folded.
    # genc is (T*B, 4H) = 8 f32 vregs at demo size; kept in registers.
    x2d = x_ref[...].reshape(T * B, Dx)
    genc = jnp.dot(x2d.astype(wih_e_ref.dtype), wih_e_ref[...],
                   preferred_element_type=jnp.float32) + be_ref[...]

    def lstm_step(pre, c):
        # pre : (B, 4H) gate pre-activations, PyTorch order along lanes:
        #       [0:H]=i, [H:2H]=f, [2H:3H]=g, [3H:4H]=o.
        # c   : (B, 4H) cell state; valid in lanes [0:H], bounded junk elsewhere
        #       (junk lanes only ever meet zero weight rows).
        sg = jax.nn.sigmoid(pre)          # 1 EUP pass, full vreg
        th = jnp.tanh(pre)                # 1 EUP pass, full vreg
        # pltpu.roll follows np.roll semantics: out[.., l] = in[.., (l-shift) % G],
        # so shift = G - k*H brings gate chunk k onto lanes [0:H] (XLU slot).
        f_al = pltpu.roll(sg, shift=G - H, axis=1)        # f -> lanes [0:H]
        g_al = pltpu.roll(th, shift=G - 2 * H, axis=1)    # g -> lanes [0:H]
        o_al = pltpu.roll(sg, shift=G - 3 * H, axis=1)    # o -> lanes [0:H]
        c_new = f_al * c + sg * g_al                      # i (= sg[:, 0:H]) * g
        h_new = o_al * jnp.tanh(c_new)                    # 1 EUP pass
        return h_new, c_new

    zeros = jnp.zeros((B, G), jnp.float32)

    # ---- encoder recurrence: Python-unrolled (static T); only the small
    # (B,4H)@(4H,4H) dot sits on the serial chain, no VMEM round-trips, so the
    # scheduler can overlap step t's gate math with step t+1's matmul push
    # (matters most for v5e/v6e's sequential MXU result FIFO).
    whh_e = whh_e_ref[...]
    h, c = zeros, zeros
    for t in range(T):
        pre = genc[t * B:(t + 1) * B, :] + jnp.dot(
            h, whh_e, preferred_element_type=jnp.float32)
        h, c = lstm_step(pre, c)
    h_enc = h

    # ---- decoder: loop-invariant input projection hoisted out of the loop.
    z_proj = jnp.dot(h_enc, wih_d_ref[...],
                     preferred_element_type=jnp.float32) + bd_ref[...]

    whh_d = whh_d_ref[...]
    h, c = zeros, zeros
    h_dec = []
    for t in range(T):
        pre = z_proj + jnp.dot(h, whh_d, preferred_element_type=jnp.float32)
        h, c = lstm_step(pre, c)
        h_dec.append(h)                  # stays in vregs (T quarter-KiB vregs)

    # ---- batched output projection + sigmoid; single lane-dense bulk store.
    h_all = jnp.concatenate(h_dec, axis=0)               # (T*B, 4H), vreg-aligned
    recon = jax.nn.sigmoid(
        jnp.dot(h_all.astype(wo_ref.dtype), wo_ref[...],
                preferred_element_type=jnp.float32) + bo_ref[...])
    out_ref[...] = recon.reshape(T, B, out_ref.shape[-1])


def make_params(key, dim_x, dim_y):
    """Deterministic synthetic parameters (shapes as a 1-layer LSTM-AE implies)."""
    H = dim_y
    ks = jax.random.split(key, 8)
    scale = 0.1
    wih_e = scale * jax.random.normal(ks[0], (dim_x, 4 * H), jnp.float32)
    whh_e = scale * jax.random.normal(ks[1], (H, 4 * H), jnp.float32)
    be    = scale * jax.random.normal(ks[2], (1, 4 * H), jnp.float32)
    wih_d = scale * jax.random.normal(ks[3], (H, 4 * H), jnp.float32)
    whh_d = scale * jax.random.normal(ks[4], (H, 4 * H), jnp.float32)
    bd    = scale * jax.random.normal(ks[5], (1, 4 * H), jnp.float32)
    wo    = scale * jax.random.normal(ks[6], (H, dim_x), jnp.float32)
    bo    = scale * jax.random.normal(ks[7], (1, dim_x), jnp.float32)
    return (wih_e, whh_e, be, wih_d, whh_d, bd, wo, bo)


def _pad_rows(w, rows):
    """Zero-pad a (r, c) weight to (rows, c); extra rows multiply junk lanes."""
    return jnp.zeros((rows, w.shape[1]), w.dtype).at[: w.shape[0]].set(w)


@functools.partial(jax.jit, static_argnames=("use_bf16_weights",))
def lstm_autoencoder(x, params, use_bf16_weights=True):
    """x: (B, T, dim_x) float32 -> reconstruction (B, T, dim_x)."""
    B, T, Dx = x.shape
    wih_e, whh_e, be, wih_d, whh_d, bd, wo, bo = params
    H = whh_e.shape[0]
    G = 4 * H

    # Lane-dense output: pad the output projection N dim to a multiple of 128.
    Dp = max(128, ((Dx + 127) // 128) * 128)

    # bf16 only for the two big batched projections (MXU throughput on v6e/v7x);
    # recurrent-path weights stay f32 (per-step dot is latency-bound).
    proj_dt = jnp.bfloat16 if use_bf16_weights else jnp.float32

    # Row-pad to 4H rows so the kernel can carry full-width (B, 4H) h/c state:
    # junk lanes [H:4H] of the state only ever hit zero weight rows.
    whh_e_p = _pad_rows(whh_e, G)
    wih_d_p = _pad_rows(wih_d, G)
    whh_d_p = _pad_rows(whh_d, G)
    wo_p = jnp.zeros((G, Dp), jnp.float32).at[:H, :Dx].set(wo).astype(proj_dt)
    bo_p = jnp.zeros((1, Dp), jnp.float32).at[:, :Dx].set(bo)

    kparams = (wih_e.astype(proj_dt), whh_e_p, be,
               wih_d_p, whh_d_p, bd, wo_p, bo_p)

    # Pad batch to a full sublane group (multiple of 8) -> dense (B, 4H) vregs.
    b_pad = max(8, ((B + 7) // 8) * 8)
    if b_pad != B:
        x = jnp.pad(x, ((0, b_pad - B), (0, 0), (0, 0)))

    # Time-major so the recurrence slices the leading (sublane-blocked) axis.
    # At demo size these wrapper transposes are negligible; at large T*B*Dx
    # they should be folded into the kernel via a grid axis + index_map.
    x_tm = jnp.transpose(x, (1, 0, 2))

    vmem = pl.BlockSpec(memory_space=pltpu.MemorySpace.VMEM)
    # Gridless on purpose: ~300 KiB of VMEM total, no scratch.  For larger
    # batches, add a leading batch grid axis with
    # dimension_semantics=("parallel",) so both v7x TensorCores are used.
    out_tm = pl.pallas_call(
        lstm_ae_kernel,
        out_shape=jax.ShapeDtypeStruct((T, b_pad, Dp), jnp.float32),
        in_specs=[vmem] * 9,
        out_specs=vmem,
    )(x_tm, *kparams)

    out = jnp.transpose(out_tm, (1, 0, 2))
    return out[:B, :, :Dx]


if __name__ == "__main__":
    B, T = 2, 8            # batch, sequence length
    dim_x, dim_y = 16, 32  # feature dim, latent/hidden dim

    key = jax.random.PRNGKey(0)
    kx, kp = jax.random.split(key)
    x = jax.random.uniform(kx, (B, T, dim_x), jnp.float32)
    params = make_params(kp, dim_x, dim_y)

    out = lstm_autoencoder(x, params, use_bf16_weights=True)
    jax.block_until_ready(out)
    assert out.shape == (B, T, dim_x)
    assert bool(jnp.all(jnp.isfinite(out)))
    assert bool(jnp.all((out > 0.0) & (out < 1.0)))   # sigmoid-squashed output
    print("KERNEL_OK")
</pallas_src>

<mosaic_0001>
module attributes {stable_mosaic.version = 11 : i64} {
  func.func @lstm_ae_kernel(%arg0: memref<8x8x16xf32, #tpu.memory_space<vmem>>, %arg1: memref<16x128xbf16, #tpu.memory_space<vmem>>, %arg2: memref<128x128xf32, #tpu.memory_space<vmem>>, %arg3: memref<1x128xf32, #tpu.memory_space<vmem>>, %arg4: memref<128x128xf32, #tpu.memory_space<vmem>>, %arg5: memref<128x128xf32, #tpu.memory_space<vmem>>, %arg6: memref<1x128xf32, #tpu.memory_space<vmem>>, %arg7: memref<128x128xbf16, #tpu.memory_space<vmem>>, %arg8: memref<1x128xf32, #tpu.memory_space<vmem>>, %arg9: memref<8x8x128xf32, #tpu.memory_space<vmem>>) attributes {dimension_semantics = [], scalar_prefetch = 0 : i64, scratch_operands = 0 : i64, tpu.core_type = #tpu.core_type<tc>} {
    %c0 = arith.constant 0 : index
    %c0_0 = arith.constant 0 : index
    %c0_1 = arith.constant 0 : index
    %0 = vector.load %arg0[%c0, %c0_0, %c0_1] : memref<8x8x16xf32, #tpu.memory_space<vmem>>, vector<8x8x16xf32>
    %1 = vector.shape_cast %0 : vector<8x8x16xf32> to vector<64x16xf32>
    %2 = arith.truncf %1 : vector<64x16xf32> to vector<64x16xbf16>
    %c0_2 = arith.constant 0 : index
    %c0_3 = arith.constant 0 : index
    %3 = vector.load %arg1[%c0_2, %c0_3] : memref<16x128xbf16, #tpu.memory_space<vmem>>, vector<16x128xbf16>
    %cst = arith.constant dense<0.000000e+00> : vector<64x128xf32>
    %4 = tpu.matmul %2, %3, %cst {dimension_numbers = #tpu.dot_dimension_numbers<[1], [0], [0], [1], [0, 0, 1, 1], [], []>} : vector<64x16xbf16>, vector<16x128xbf16>, vector<64x128xf32> -> vector<64x128xf32>
    %c0_4 = arith.constant 0 : index
    %c0_5 = arith.constant 0 : index
    %5 = vector.load %arg3[%c0_4, %c0_5] : memref<1x128xf32, #tpu.memory_space<vmem>>, vector<1x128xf32>
    %6 = vector.broadcast %5 : vector<1x128xf32> to vector<64x128xf32>
    %7 = arith.addf %4, %6 : vector<64x128xf32>
    %cst_6 = arith.constant 0.000000e+00 : f32
    %8 = vector.broadcast %cst_6 : f32 to vector<8x128xf32>
    %c0_7 = arith.constant 0 : index
    %c0_8 = arith.constant 0 : index
    %9 = vector.load %arg2[%c0_7, %c0_8] : memref<128x128xf32, #tpu.memory_space<vmem>>, vector<128x128xf32>
    %10 = vector.extract_strided_slice %7 {offsets = [0, 0], sizes = [8, 128], strides = [1, 1]} : vector<64x128xf32> to vector<8x128xf32>
    %cst_9 = arith.constant dense<0.000000e+00> : vector<8x128xf32>
    %11 = tpu.matmul %8, %9, %cst_9 {dimension_numbers = #tpu.dot_dimension_numbers<[1], [0], [0], [1], [0, 0, 1, 1], [], []>} : vector<8x128xf32>, vector<128x128xf32>, vector<8x128xf32> -> vector<8x128xf32>
    %12 = arith.addf %10, %11 : vector<8x128xf32>
    %13 = arith.negf %12 : vector<8x128xf32>
    %14 = math.exp %13 : vector<8x128xf32>
    %cst_10 = arith.constant 1.000000e+00 : f32
    %15 = vector.broadcast %cst_10 : f32 to vector<8x128xf32>
    %16 = arith.addf %15, %14 : vector<8x128xf32>
    %17 = arith.divf %15, %16 : vector<8x128xf32>
    %18 = math.tanh %12 : vector<8x128xf32>
    %c96_i32 = arith.constant 96 : i32
    %19 = tpu.dynamic_rotate %17 by %c96_i32 dim 1 : vector<8x128xf32>, i32 -> vector<8x128xf32>
    %c64_i32 = arith.constant 64 : i32
    %20 = tpu.dynamic_rotate %18 by %c64_i32 dim 1 : vector<8x128xf32>, i32 -> vector<8x128xf32>
    %c32_i32 = arith.constant 32 : i32
    %21 = tpu.dynamic_rotate %17 by %c32_i32 dim 1 : vector<8x128xf32>, i32 -> vector<8x128xf32>
    %22 = arith.mulf %19, %8 : vector<8x128xf32>
    %23 = arith.mulf %17, %20 : vector<8x128xf32>
    %24 = arith.addf %22, %23 : vector<8x128xf32>
    %25 = math.tanh %24 : vector<8x128xf32>
    %26 = arith.mulf %21, %25 : vector<8x128xf32>
    %27 = vector.extract_strided_slice %7 {offsets = [8, 0], sizes = [8, 128], strides = [1, 1]} : vector<64x128xf32> to vector<8x128xf32>
    %cst_11 = arith.constant dense<0.000000e+00> : vector<8x128xf32>
    %28 = tpu.matmul %26, %9, %cst_11 {dimension_numbers = #tpu.dot_dimension_numbers<[1], [0], [0], [1], [0, 0, 1, 1], [], []>} : vector<8x128xf32>, vector<128x128xf32>, vector<8x128xf32> -> vector<8x128xf32>
    %29 = arith.addf %27, %28 : vector<8x128xf32>
    %30 = arith.negf %29 : vector<8x128xf32>
    %31 = math.exp %30 : vector<8x128xf32>
    %cst_12 = arith.constant 1.000000e+00 : f32
    %32 = vector.broadcast %cst_12 : f32 to vector<8x128xf32>
    %33 = arith.addf %32, %31 : vector<8x128xf32>
    %34 = arith.divf %32, %33 : vector<8x128xf32>
    %35 = math.tanh %29 : vector<8x128xf32>
    %c96_i32_13 = arith.constant 96 : i32
    %36 = tpu.dynamic_rotate %34 by %c96_i32_13 dim 1 : vector<8x128xf32>, i32 -> vector<8x128xf32>
    %c64_i32_14 = arith.constant 64 : i32
    %37 = tpu.dynamic_rotate %35 by %c64_i32_14 dim 1 : vector<8x128xf32>, i32 -> vector<8x128xf32>
    %c32_i32_15 = arith.constant 32 : i32
    %38 = tpu.dynamic_rotate %34 by %c32_i32_15 dim 1 : vector<8x128xf32>, i32 -> vector<8x128xf32>
    %39 = arith.mulf %36, %24 : vector<8x128xf32>
    %40 = arith.mulf %34, %37 : vector<8x128xf32>
    %41 = arith.addf %39, %40 : vector<8x128xf32>
    %42 = math.tanh %41 : vector<8x128xf32>
    %43 = arith.mulf %38, %42 : vector<8x128xf32>
    %44 = vector.extract_strided_slice %7 {offsets = [16, 0], sizes = [8, 128], strides = [1, 1]} : vector<64x128xf32> to vector<8x128xf32>
    %cst_16 = arith.constant dense<0.000000e+00> : vector<8x128xf32>
    %45 = tpu.matmul %43, %9, %cst_16 {dimension_numbers = #tpu.dot_dimension_numbers<[1], [0], [0], [1], [0, 0, 1, 1], [], []>} : vector<8x128xf32>, vector<128x128xf32>, vector<8x128xf32> -> vector<8x128xf32>
    %46 = arith.addf %44, %45 : vector<8x128xf32>
    %47 = arith.negf %46 : vector<8x128xf32>
    %48 = math.exp %47 : vector<8x128xf32>
    %cst_17 = arith.constant 1.000000e+00 : f32
    %49 = vector.broadcast %cst_17 : f32 to vector<8x128xf32>
    %50 = arith.addf %49, %48 : vector<8x128xf32>
    %51 = arith.divf %49, %50 : vector<8x128xf32>
    %52 = math.tanh %46 : vector<8x128xf32>
    %c96_i32_18 = arith.constant 96 : i32
    %53 = tpu.dynamic_rotate %51 by %c96_i32_18 dim 1 : vector<8x128xf32>, i32 -> vector<8x128xf32>
    %c64_i32_19 = arith.constant 64 : i32
    %54 = tpu.dynamic_rotate %52 by %c64_i32_19 dim 1 : vector<8x128xf32>, i32 -> vector<8x128xf32>
    %c32_i32_20 = arith.constant 32 : i32
    %55 = tpu.dynamic_rotate %51 by %c32_i32_20 dim 1 : vector<8x128xf32>, i32 -> vector<8x128xf32>
    %56 = arith.mulf %53, %41 : vector<8x128xf32>
    %57 = arith.mulf %51, %54 : vector<8x128xf32>
    %58 = arith.addf %56, %57 : vector<8x128xf32>
    %59 = math.tanh %58 : vector<8x128xf32>
    %60 = arith.mulf %55, %59 : vector<8x128xf32>
    %61 = vector.extract_strided_slice %7 {offsets = [24, 0], sizes = [8, 128], strides = [1, 1]} : vector<64x128xf32> to vector<8x128xf32>
    %cst_21 = arith.constant dense<0.000000e+00> : vector<8x128xf32>
    %62 = tpu.matmul %60, %9, %cst_21 {dimension_numbers = #tpu.dot_dimension_numbers<[1], [0], [0], [1], [0, 0, 1, 1], [], []>} : vector<8x128xf32>, vector<128x128xf32>, vector<8x128xf32> -> vector<8x128xf32>
    %63 = arith.addf %61, %62 : vector<8x128xf32>
    %64 = arith.negf %63 : vector<8x128xf32>
    %65 = math.exp %64 : vector<8x128xf32>
    %cst_22 = arith.constant 1.000000e+00 : f32
    %66 = vector.broadcast %cst_22 : f32 to vector<8x128xf32>
    %67 = arith.addf %66, %65 : vector<8x128xf32>
    %68 = arith.divf %66, %67 : vector<8x128xf32>
    %69 = math.tanh %63 : vector<8x128xf32>
    %c96_i32_23 = arith.constant 96 : i32
    %70 = tpu.dynamic_rotate %68 by %c96_i32_23 dim 1 : vector<8x128xf32>, i32 -> vector<8x128xf32>
    %c64_i32_24 = arith.constant 64 : i32
    %71 = tpu.dynamic_rotate %69 by %c64_i32_24 dim 1 : vector<8x128xf32>, i32 -> vector<8x128xf32>
    %c32_i32_25 = arith.constant 32 : i32
    %72 = tpu.dynamic_rotate %68 by %c32_i32_25 dim 1 : vector<8x128xf32>, i32 -> vector<8x128xf32>
    %73 = arith.mulf %70, %58 : vector<8x128xf32>
    %74 = arith.mulf %68, %71 : vector<8x128xf32>
    %75 = arith.addf %73, %74 : vector<8x128xf32>
    %76 = math.tanh %75 : vector<8x128xf32>
    %77 = arith.mulf %72, %76 : vector<8x128xf32>
    %78 = vector.extract_strided_slice %7 {offsets = [32, 0], sizes = [8, 128], strides = [1, 1]} : vector<64x128xf32> to vector<8x128xf32>
    %cst_26 = arith.constant dense<0.000000e+00> : vector<8x128xf32>
    %79 = tpu.matmul %77, %9, %cst_26 {dimension_numbers = #tpu.dot_dimension_numbers<[1], [0], [0], [1], [0, 0, 1, 1], [], []>} : vector<8x128xf32>, vector<128x128xf32>, vector<8x128xf32> -> vector<8x128xf32>
    %80 = arith.addf %78, %79 : vector<8x128xf32>
    %81 = arith.negf %80 : vector<8x128xf32>
    %82 = math.exp %81 : vector<8x128xf32>
    %cst_27 = arith.constant 1.000000e+00 : f32
    %83 = vector.broadcast %cst_27 : f32 to vector<8x128xf32>
    %84 = arith.addf %83, %82 : vector<8x128xf32>
    %85 = arith.divf %83, %84 : vector<8x128xf32>
    %86 = math.tanh %80 : vector<8x128xf32>
    %c96_i32_28 = arith.constant 96 : i32
    %87 = tpu.dynamic_rotate %85 by %c96_i32_28 dim 1 : vector<8x128xf32>, i32 -> vector<8x128xf32>
    %c64_i32_29 = arith.constant 64 : i32
    %88 = tpu.dynamic_rotate %86 by %c64_i32_29 dim 1 : vector<8x128xf32>, i32 -> vector<8x128xf32>
    %c32_i32_30 = arith.constant 32 : i32
    %89 = tpu.dynamic_rotate %85 by %c32_i32_30 dim 1 : vector<8x128xf32>, i32 -> vector<8x128xf32>
    %90 = arith.mulf %87, %75 : vector<8x128xf32>
    %91 = arith.mulf %85, %88 : vector<8x128xf32>
    %92 = arith.addf %90, %91 : vector<8x128xf32>
    %93 = math.tanh %92 : vector<8x128xf32>
    %94 = arith.mulf %89, %93 : vector<8x128xf32>
    %95 = vector.extract_strided_slice %7 {offsets = [40, 0], sizes = [8, 128], strides = [1, 1]} : vector<64x128xf32> to vector<8x128xf32>
    %cst_31 = arith.constant dense<0.000000e+00> : vector<8x128xf32>
    %96 = tpu.matmul %94, %9, %cst_31 {dimension_numbers = #tpu.dot_dimension_numbers<[1], [0], [0], [1], [0, 0, 1, 1], [], []>} : vector<8x128xf32>, vector<128x128xf32>, vector<8x128xf32> -> vector<8x128xf32>
    %97 = arith.addf %95, %96 : vector<8x128xf32>
    %98 = arith.negf %97 : vector<8x128xf32>
    %99 = math.exp %98 : vector<8x128xf32>
    %cst_32 = arith.constant 1.000000e+00 : f32
    %100 = vector.broadcast %cst_32 : f32 to vector<8x128xf32>
    %101 = arith.addf %100, %99 : vector<8x128xf32>
    %102 = arith.divf %100, %101 : vector<8x128xf32>
    %103 = math.tanh %97 : vector<8x128xf32>
    %c96_i32_33 = arith.constant 96 : i32
    %104 = tpu.dynamic_rotate %102 by %c96_i32_33 dim 1 : vector<8x128xf32>, i32 -> vector<8x128xf32>
    %c64_i32_34 = arith.constant 64 : i32
    %105 = tpu.dynamic_rotate %103 by %c64_i32_34 dim 1 : vector<8x128xf32>, i32 -> vector<8x128xf32>
    %c32_i32_35 = arith.constant 32 : i32
    %106 = tpu.dynamic_rotate %102 by %c32_i32_35 dim 1 : vector<8x128xf32>, i32 -> vector<8x128xf32>
    %107 = arith.mulf %104, %92 : vector<8x128xf32>
    %108 = arith.mulf %102, %105 : vector<8x128xf32>
    %109 = arith.addf %107, %108 : vector<8x128xf32>
    %110 = math.tanh %109 : vector<8x128xf32>
    %111 = arith.mulf %106, %110 : vector<8x128xf32>
    %112 = vector.extract_strided_slice %7 {offsets = [48, 0], sizes = [8, 128], strides = [1, 1]} : vector<64x128xf32> to vector<8x128xf32>
    %cst_36 = arith.constant dense<0.000000e+00> : vector<8x128xf32>
    %113 = tpu.matmul %111, %9, %cst_36 {dimension_numbers = #tpu.dot_dimension_numbers<[1], [0], [0], [1], [0, 0, 1, 1], [], []>} : vector<8x128xf32>, vector<128x128xf32>, vector<8x128xf32> -> vector<8x128xf32>
    %114 = arith.addf %112, %113 : vector<8x128xf32>
    %115 = arith.negf %114 : vector<8x128xf32>
    %116 = math.exp %115 : vector<8x128xf32>
    %cst_37 = arith.constant 1.000000e+00 : f32
    %117 = vector.broadcast %cst_37 : f32 to vector<8x128xf32>
    %118 = arith.addf %117, %116 : vector<8x128xf32>
    %119 = arith.divf %117, %118 : vector<8x128xf32>
    %120 = math.tanh %114 : vector<8x128xf32>
    %c96_i32_38 = arith.constant 96 : i32
    %121 = tpu.dynamic_rotate %119 by %c96_i32_38 dim 1 : vector<8x128xf32>, i32 -> vector<8x128xf32>
    %c64_i32_39 = arith.constant 64 : i32
    %122 = tpu.dynamic_rotate %120 by %c64_i32_39 dim 1 : vector<8x128xf32>, i32 -> vector<8x128xf32>
    %c32_i32_40 = arith.constant 32 : i32
    %123 = tpu.dynamic_rotate %119 by %c32_i32_40 dim 1 : vector<8x128xf32>, i32 -> vector<8x128xf32>
    %124 = arith.mulf %121, %109 : vector<8x128xf32>
    %125 = arith.mulf %119, %122 : vector<8x128xf32>
    %126 = arith.addf %124, %125 : vector<8x128xf32>
    %127 = math.tanh %126 : vector<8x128xf32>
    %128 = arith.mulf %123, %127 : vector<8x128xf32>
    %129 = vector.extract_strided_slice %7 {offsets = [56, 0], sizes = [8, 128], strides = [1, 1]} : vector<64x128xf32> to vector<8x128xf32>
    %cst_41 = arith.constant dense<0.000000e+00> : vector<8x128xf32>
    %130 = tpu.matmul %128, %9, %cst_41 {dimension_numbers = #tpu.dot_dimension_numbers<[1], [0], [0], [1], [0, 0, 1, 1], [], []>} : vector<8x128xf32>, vector<128x128xf32>, vector<8x128xf32> -> vector<8x128xf32>
    %131 = arith.addf %129, %130 : vector<8x128xf32>
    %132 = arith.negf %131 : vector<8x128xf32>
    %133 = math.exp %132 : vector<8x128xf32>
    %cst_42 = arith.constant 1.000000e+00 : f32
    %134 = vector.broadcast %cst_42 : f32 to vector<8x128xf32>
    %135 = arith.addf %134, %133 : vector<8x128xf32>
    %136 = arith.divf %134, %135 : vector<8x128xf32>
    %137 = math.tanh %131 : vector<8x128xf32>
    %c96_i32_43 = arith.constant 96 : i32
    %138 = tpu.dynamic_rotate %136 by %c96_i32_43 dim 1 : vector<8x128xf32>, i32 -> vector<8x128xf32>
    %c64_i32_44 = arith.constant 64 : i32
    %139 = tpu.dynamic_rotate %137 by %c64_i32_44 dim 1 : vector<8x128xf32>, i32 -> vector<8x128xf32>
    %c32_i32_45 = arith.constant 32 : i32
    %140 = tpu.dynamic_rotate %136 by %c32_i32_45 dim 1 : vector<8x128xf32>, i32 -> vector<8x128xf32>
    %141 = arith.mulf %138, %126 : vector<8x128xf32>
    %142 = arith.mulf %136, %139 : vector<8x128xf32>
    %143 = arith.addf %141, %142 : vector<8x128xf32>
    %144 = math.tanh %143 : vector<8x128xf32>
    %145 = arith.mulf %140, %144 : vector<8x128xf32>
    %c0_46 = arith.constant 0 : index
    %c0_47 = arith.constant 0 : index
    %146 = vector.load %arg4[%c0_46, %c0_47] : memref<128x128xf32, #tpu.memory_space<vmem>>, vector<128x128xf32>
    %cst_48 = arith.constant dense<0.000000e+00> : vector<8x128xf32>
    %147 = tpu.matmul %145, %146, %cst_48 {dimension_numbers = #tpu.dot_dimension_numbers<[1], [0], [0], [1], [0, 0, 1, 1], [], []>} : vector<8x128xf32>, vector<128x128xf32>, vector<8x128xf32> -> vector<8x128xf32>
    %c0_49 = arith.constant 0 : index
    %c0_50 = arith.constant 0 : index
    %148 = vector.load %arg6[%c0_49, %c0_50] : memref<1x128xf32, #tpu.memory_space<vmem>>, vector<1x128xf32>
    %149 = vector.broadcast %148 : vector<1x128xf32> to vector<8x128xf32>
    %150 = arith.addf %147, %149 : vector<8x128xf32>
    %c0_51 = arith.constant 0 : index
    %c0_52 = arith.constant 0 : index
    %151 = vector.load %arg5[%c0_51, %c0_52] : memref<128x128xf32, #tpu.memory_space<vmem>>, vector<128x128xf32>
    %cst_53 = arith.constant dense<0.000000e+00> : vector<8x128xf32>
    %152 = tpu.matmul %8, %151, %cst_53 {dimension_numbers = #tpu.dot_dimension_numbers<[1], [0], [0], [1], [0, 0, 1, 1], [], []>} : vector<8x128xf32>, vector<128x128xf32>, vector<8x128xf32> -> vector<8x128xf32>
    %153 = arith.addf %150, %152 : vector<8x128xf32>
    %154 = arith.negf %153 : vector<8x128xf32>
    %155 = math.exp %154 : vector<8x128xf32>
    %cst_54 = arith.constant 1.000000e+00 : f32
    %156 = vector.broadcast %cst_54 : f32 to vector<8x128xf32>
    %157 = arith.addf %156, %155 : vector<8x128xf32>
    %158 = arith.divf %156, %157 : vector<8x128xf32>
    %159 = math.tanh %153 : vector<8x128xf32>
    %c96_i32_55 = arith.constant 96 : i32
    %160 = tpu.dynamic_rotate %158 by %c96_i32_55 dim 1 : vector<8x128xf32>, i32 -> vector<8x128xf32>
    %c64_i32_56 = arith.constant 64 : i32
    %161 = tpu.dynamic_rotate %159 by %c64_i32_56 dim 1 : vector<8x128xf32>, i32 -> vector<8x128xf32>
    %c32_i32_57 = arith.constant 32 : i32
    %162 = tpu.dynamic_rotate %158 by %c32_i32_57 dim 1 : vector<8x128xf32>, i32 -> vector<8x128xf32>
    %163 = arith.mulf %160, %8 : vector<8x128xf32>
    %164 = arith.mulf %158, %161 : vector<8x128xf32>
    %165 = arith.addf %163, %164 : vector<8x128xf32>
    %166 = math.tanh %165 : vector<8x128xf32>
    %167 = arith.mulf %162, %166 : vector<8x128xf32>
    %cst_58 = arith.constant dense<0.000000e+00> : vector<8x128xf32>
    %168 = tpu.matmul %167, %151, %cst_58 {dimension_numbers = #tpu.dot_dimension_numbers<[1], [0], [0], [1], [0, 0, 1, 1], [], []>} : vector<8x128xf32>, vector<128x128xf32>, vector<8x128xf32> -> vector<8x128xf32>
    %169 = arith.addf %150, %168 : vector<8x128xf32>
    %170 = arith.negf %169 : vector<8x128xf32>
    %171 = math.exp %170 : vector<8x128xf32>
    %cst_59 = arith.constant 1.000000e+00 : f32
    %172 = vector.broadcast %cst_59 : f32 to vector<8x128xf32>
    %173 = arith.addf %172, %171 : vector<8x128xf32>
    %174 = arith.divf %172, %173 : vector<8x128xf32>
    %175 = math.tanh %169 : vector<8x128xf32>
    %c96_i32_60 = arith.constant 96 : i32
    %176 = tpu.dynamic_rotate %174 by %c96_i32_60 dim 1 : vector<8x128xf32>, i32 -> vector<8x128xf32>
    %c64_i32_61 = arith.constant 64 : i32
    %177 = tpu.dynamic_rotate %175 by %c64_i32_61 dim 1 : vector<8x128xf32>, i32 -> vector<8x128xf32>
    %c32_i32_62 = arith.constant 32 : i32
    %178 = tpu.dynamic_rotate %174 by %c32_i32_62 dim 1 : vector<8x128xf32>, i32 -> vector<8x128xf32>
    %179 = arith.mulf %176, %165 : vector<8x128xf32>
    %180 = arith.mulf %174, %177 : vector<8x128xf32>
    %181 = arith.addf %179, %180 : vector<8x128xf32>
    %182 = math.tanh %181 : vector<8x128xf32>
    %183 = arith.mulf %178, %182 : vector<8x128xf32>
    %cst_63 = arith.constant dense<0.000000e+00> : vector<8x128xf32>
    %184 = tpu.matmul %183, %151, %cst_63 {dimension_numbers = #tpu.dot_dimension_numbers<[1], [0], [0], [1], [0, 0, 1, 1], [], []>} : vector<8x128xf32>, vector<128x128xf32>, vector<8x128xf32> -> vector<8x128xf32>
    %185 = arith.addf %150, %184 : vector<8x128xf32>
    %186 = arith.negf %185 : vector<8x128xf32>
    %187 = math.exp %186 : vector<8x128xf32>
    %cst_64 = arith.constant 1.000000e+00 : f32
    %188 = vector.broadcast %cst_64 : f32 to vector<8x128xf32>
    %189 = arith.addf %188, %187 : vector<8x128xf32>
    %190 = arith.divf %188, %189 : vector<8x128xf32>
    %191 = math.tanh %185 : vector<8x128xf32>
    %c96_i32_65 = arith.constant 96 : i32
    %192 = tpu.dynamic_rotate %190 by %c96_i32_65 dim 1 : vector<8x128xf32>, i32 -> vector<8x128xf32>
    %c64_i32_66 = arith.constant 64 : i32
    %193 = tpu.dynamic_rotate %191 by %c64_i32_66 dim 1 : vector<8x128xf32>, i32 -> vector<8x128xf32>
    %c32_i32_67 = arith.constant 32 : i32
    %194 = tpu.dynamic_rotate %190 by %c32_i32_67 dim 1 : vector<8x128xf32>, i32 -> vector<8x128xf32>
    %195 = arith.mulf %192, %181 : vector<8x128xf32>
    %196 = arith.mulf %190, %193 : vector<8x128xf32>
    %197 = arith.addf %195, %196 : vector<8x128xf32>
    %198 = math.tanh %197 : vector<8x128xf32>
    %199 = arith.mulf %194, %198 : vector<8x128xf32>
    %cst_68 = arith.constant dense<0.000000e+00> : vector<8x128xf32>
    %200 = tpu.matmul %199, %151, %cst_68 {dimension_numbers = #tpu.dot_dimension_numbers<[1], [0], [0], [1], [0, 0, 1, 1], [], []>} : vector<8x128xf32>, vector<128x128xf32>, vector<8x128xf32> -> vector<8x128xf32>
    %201 = arith.addf %150, %200 : vector<8x128xf32>
    %202 = arith.negf %201 : vector<8x128xf32>
    %203 = math.exp %202 : vector<8x128xf32>
    %cst_69 = arith.constant 1.000000e+00 : f32
    %204 = vector.broadcast %cst_69 : f32 to vector<8x128xf32>
    %205 = arith.addf %204, %203 : vector<8x128xf32>
    %206 = arith.divf %204, %205 : vector<8x128xf32>
    %207 = math.tanh %201 : vector<8x128xf32>
    %c96_i32_70 = arith.constant 96 : i32
    %208 = tpu.dynamic_rotate %206 by %c96_i32_70 dim 1 : vector<8x128xf32>, i32 -> vector<8x128xf32>
    %c64_i32_71 = arith.constant 64 : i32
    %209 = tpu.dynamic_rotate %207 by %c64_i32_71 dim 1 : vector<8x128xf32>, i32 -> vector<8x128xf32>
    %c32_i32_72 = arith.constant 32 : i32
    %210 = tpu.dynamic_rotate %206 by %c32_i32_72 dim 1 : vector<8x128xf32>, i32 -> vector<8x128xf32>
    %211 = arith.mulf %208, %197 : vector<8x128xf32>
    %212 = arith.mulf %206, %209 : vector<8x128xf32>
    %213 = arith.addf %211, %212 : vector<8x128xf32>
    %214 = math.tanh %213 : vector<8x128xf32>
    %215 = arith.mulf %210, %214 : vector<8x128xf32>
    %cst_73 = arith.constant dense<0.000000e+00> : vector<8x128xf32>
    %216 = tpu.matmul %215, %151, %cst_73 {dimension_numbers = #tpu.dot_dimension_numbers<[1], [0], [0], [1], [0, 0, 1, 1], [], []>} : vector<8x128xf32>, vector<128x128xf32>, vector<8x128xf32> -> vector<8x128xf32>
    %217 = arith.addf %150, %216 : vector<8x128xf32>
    %218 = arith.negf %217 : vector<8x128xf32>
    %219 = math.exp %218 : vector<8x128xf32>
    %cst_74 = arith.constant 1.000000e+00 : f32
    %220 = vector.broadcast %cst_74 : f32 to vector<8x128xf32>
    %221 = arith.addf %220, %219 : vector<8x128xf32>
    %222 = arith.divf %220, %221 : vector<8x128xf32>
    %223 = math.tanh %217 : vector<8x128xf32>
    %c96_i32_75 = arith.constant 96 : i32
    %224 = tpu.dynamic_rotate %222 by %c96_i32_75 dim 1 : vector<8x128xf32>, i32 -> vector<8x128xf32>
    %c64_i32_76 = arith.constant 64 : i32
    %225 = tpu.dynamic_rotate %223 by %c64_i32_76 dim 1 : vector<8x128xf32>, i32 -> vector<8x128xf32>
    %c32_i32_77 = arith.constant 32 : i32
    %226 = tpu.dynamic_rotate %222 by %c32_i32_77 dim 1 : vector<8x128xf32>, i32 -> vector<8x128xf32>
    %227 = arith.mulf %224, %213 : vector<8x128xf32>
    %228 = arith.mulf %222, %225 : vector<8x128xf32>
    %229 = arith.addf %227, %228 : vector<8x128xf32>
    %230 = math.tanh %229 : vector<8x128xf32>
    %231 = arith.mulf %226, %230 : vector<8x128xf32>
    %cst_78 = arith.constant dense<0.000000e+00> : vector<8x128xf32>
    %232 = tpu.matmul %231, %151, %cst_78 {dimension_numbers = #tpu.dot_dimension_numbers<[1], [0], [0], [1], [0, 0, 1, 1], [], []>} : vector<8x128xf32>, vector<128x128xf32>, vector<8x128xf32> -> vector<8x128xf32>
    %233 = arith.addf %150, %232 : vector<8x128xf32>
    %234 = arith.negf %233 : vector<8x128xf32>
    %235 = math.exp %234 : vector<8x128xf32>
    %cst_79 = arith.constant 1.000000e+00 : f32
    %236 = vector.broadcast %cst_79 : f32 to vector<8x128xf32>
    %237 = arith.addf %236, %235 : vector<8x128xf32>
    %238 = arith.divf %236, %237 : vector<8x128xf32>
    %239 = math.tanh %233 : vector<8x128xf32>
    %c96_i32_80 = arith.constant 96 : i32
    %240 = tpu.dynamic_rotate %238 by %c96_i32_80 dim 1 : vector<8x128xf32>, i32 -> vector<8x128xf32>
    %c64_i32_81 = arith.constant 64 : i32
    %241 = tpu.dynamic_rotate %239 by %c64_i32_81 dim 1 : vector<8x128xf32>, i32 -> vector<8x128xf32>
    %c32_i32_82 = arith.constant 32 : i32
    %242 = tpu.dynamic_rotate %238 by %c32_i32_82 dim 1 : vector<8x128xf32>, i32 -> vector<8x128xf32>
    %243 = arith.mulf %240, %229 : vector<8x128xf32>
    %244 = arith.mulf %238, %241 : vector<8x128xf32>
    %245 = arith.addf %243, %244 : vector<8x128xf32>
    %246 = math.tanh %245 : vector<8x128xf32>
    %247 = arith.mulf %242, %246 : vector<8x128xf32>
    %cst_83 = arith.constant dense<0.000000e+00> : vector<8x128xf32>
    %248 = tpu.matmul %247, %151, %cst_83 {dimension_numbers = #tpu.dot_dimension_numbers<[1], [0], [0], [1], [0, 0, 1, 1], [], []>} : vector<8x128xf32>, vector<128x128xf32>, vector<8x128xf32> -> vector<8x128xf32>
    %249 = arith.addf %150, %248 : vector<8x128xf32>
    %250 = arith.negf %249 : vector<8x128xf32>
    %251 = math.exp %250 : vector<8x128xf32>
    %cst_84 = arith.constant 1.000000e+00 : f32
    %252 = vector.broadcast %cst_84 : f32 to vector<8x128xf32>
    %253 = arith.addf %252, %251 : vector<8x128xf32>
    %254 = arith.divf %252, %253 : vector<8x128xf32>
    %255 = math.tanh %249 : vector<8x128xf32>
    %c96_i32_85 = arith.constant 96 : i32
    %256 = tpu.dynamic_rotate %254 by %c96_i32_85 dim 1 : vector<8x128xf32>, i32 -> vector<8x128xf32>
    %c64_i32_86 = arith.constant 64 : i32
    %257 = tpu.dynamic_rotate %255 by %c64_i32_86 dim 1 : vector<8x128xf32>, i32 -> vector<8x128xf32>
    %c32_i32_87 = arith.constant 32 : i32
    %258 = tpu.dynamic_rotate %254 by %c32_i32_87 dim 1 : vector<8x128xf32>, i32 -> vector<8x128xf32>
    %259 = arith.mulf %256, %245 : vector<8x128xf32>
    %260 = arith.mulf %254, %257 : vector<8x128xf32>
    %261 = arith.addf %259, %260 : vector<8x128xf32>
    %262 = math.tanh %261 : vector<8x128xf32>
    %263 = arith.mulf %258, %262 : vector<8x128xf32>
    %cst_88 = arith.constant dense<0.000000e+00> : vector<8x128xf32>
    %264 = tpu.matmul %263, %151, %cst_88 {dimension_numbers = #tpu.dot_dimension_numbers<[1], [0], [0], [1], [0, 0, 1, 1], [], []>} : vector<8x128xf32>, vector<128x128xf32>, vector<8x128xf32> -> vector<8x128xf32>
    %265 = arith.addf %150, %264 : vector<8x128xf32>
    %266 = arith.negf %265 : vector<8x128xf32>
    %267 = math.exp %266 : vector<8x128xf32>
    %cst_89 = arith.constant 1.000000e+00 : f32
    %268 = vector.broadcast %cst_89 : f32 to vector<8x128xf32>
    %269 = arith.addf %268, %267 : vector<8x128xf32>
    %270 = arith.divf %268, %269 : vector<8x128xf32>
    %271 = math.tanh %265 : vector<8x128xf32>
    %c96_i32_90 = arith.constant 96 : i32
    %272 = tpu.dynamic_rotate %270 by %c96_i32_90 dim 1 : vector<8x128xf32>, i32 -> vector<8x128xf32>
    %c64_i32_91 = arith.constant 64 : i32
    %273 = tpu.dynamic_rotate %271 by %c64_i32_91 dim 1 : vector<8x128xf32>, i32 -> vector<8x128xf32>
    %c32_i32_92 = arith.constant 32 : i32
    %274 = tpu.dynamic_rotate %270 by %c32_i32_92 dim 1 : vector<8x128xf32>, i32 -> vector<8x128xf32>
    %275 = arith.mulf %272, %261 : vector<8x128xf32>
    %276 = arith.mulf %270, %273 : vector<8x128xf32>
    %277 = arith.addf %275, %276 : vector<8x128xf32>
    %278 = math.tanh %277 : vector<8x128xf32>
    %279 = arith.mulf %274, %278 : vector<8x128xf32>
    %280 = tpu.concatenate %167, %183, %199, %215, %231, %247, %263, %279 in 0 : vector<8x128xf32>, vector<8x128xf32>, vector<8x128xf32>, vector<8x128xf32>, vector<8x128xf32>, vector<8x128xf32>, vector<8x128xf32>, vector<8x128xf32> -> vector<64x128xf32>
    %281 = arith.truncf %280 : vector<64x128xf32> to vector<64x128xbf16>
    %c0_93 = arith.constant 0 : index
    %c0_94 = arith.constant 0 : index
    %282 = vector.load %arg7[%c0_93, %c0_94] : memref<128x128xbf16, #tpu.memory_space<vmem>>, vector<128x128xbf16>
    %cst_95 = arith.constant dense<0.000000e+00> : vector<64x128xf32>
    %283 = tpu.matmul %281, %282, %cst_95 {dimension_numbers = #tpu.dot_dimension_numbers<[1], [0], [0], [1], [0, 0, 1, 1], [], []>} : vector<64x128xbf16>, vector<128x128xbf16>, vector<64x128xf32> -> vector<64x128xf32>
    %c0_96 = arith.constant 0 : index
    %c0_97 = arith.constant 0 : index
    %284 = vector.load %arg8[%c0_96, %c0_97] : memref<1x128xf32, #tpu.memory_space<vmem>>, vector<1x128xf32>
    %285 = vector.broadcast %284 : vector<1x128xf32> to vector<64x128xf32>
    %286 = arith.addf %283, %285 : vector<64x128xf32>
    %287 = arith.negf %286 : vector<64x128xf32>
    %288 = math.exp %287 : vector<64x128xf32>
    %cst_98 = arith.constant 1.000000e+00 : f32
    %289 = vector.broadcast %cst_98 : f32 to vector<64x128xf32>
    %290 = arith.addf %289, %288 : vector<64x128xf32>
    %291 = arith.divf %289, %290 : vector<64x128xf32>
    %292 = vector.shape_cast %291 : vector<64x128xf32> to vector<8x8x128xf32>
    %c0_99 = arith.constant 0 : index
    %c0_100 = arith.constant 0 : index
    %c0_101 = arith.constant 0 : index
    %293 = vector.load %arg9[%c0_99, %c0_100, %c0_101] : memref<8x8x128xf32, #tpu.memory_space<vmem>>, vector<8x8x128xf32>
    tpu.vector_store %arg9[%c0_99, %c0_100, %c0_101], %292 {strides = array<i32>} : memref<8x8x128xf32, #tpu.memory_space<vmem>>, vector<8x8x128xf32>,
    return
  }
}

</mosaic_0001>

<bundles_post_ra>
// kernel: lstm_autoencoder.1
= control target key start
LH: loop header
LB: loop body
LE: loop exit
PB: predicated region body
PF: predicated region fallthrough
CT: control target
= control target key end

     0   :  { %v3445_v1 = vmov 0.0|0.0   ;;  %vm3446_vm0 = vmmov 0   ;;  %v3447_v2 = vmov 0.0   ;;  %vm60_vm1 = vcmask 130048   ;;  %s3449_s15 = smov 96   ;;  %s3450_s16 = smov 64   ;;  %s4179_s1 = inlined_call_operand.vmem [shape: bf16[16,128], index: 1, kind: input, shape index: {}]   ;;  %s4180_s0 = inlined_call_operand.vmem [shape: f32[8,8,16], index: 0, kind: input, shape index: {}]   ;;  %s4181_s2 = inlined_call_operand.vmem [shape: f32[128,128], index: 2, kind: input, shape index: {}]   ;;  %s4182_s3 = inlined_call_operand.vmem [shape: f32[1,128], index: 3, kind: input, shape index: {}]   ;;  %s4183_s4 = inlined_call_operand.vmem [shape: f32[128,128], index: 4, kind: input, shape index: {}]   ;;  %s4184_s5 = inlined_call_operand.vmem [shape: f32[128,128], index: 5, kind: input, shape index: {}]   ;;  %s4185_s6 = inlined_call_operand.vmem [shape: f32[1,128], index: 6, kind: input, shape index: {}]   ;;  %s4186_s7 = inlined_call_operand.vmem [shape: bf16[128,128], index: 7, kind: input, shape index: {}]   ;;  %s4187_s8 = inlined_call_operand.vmem [shape: f32[1,128], index: 8, kind: input, shape index: {}]   ;;  %s4188_s9 = inlined_call_operand.vmem [shape: f32[8,8,128], index: 9, kind: output, shape index: {}]  }
   0x1   :  { %v3276_v0 = vld [vmem:[%s4179_s1] sm:$0xff]   ;;  %2886 = vmatprep.subr.bf16.mxu0 %v3445_v1  ;;  %2310 = vmatprep.mubr.msk.f32.mxu0 %vm3446_vm0, %v3447_v2  ;;  %v34_v4 = vld [vmem:[%s4180_s0 + $0x8] sm:$0xff]  ;;  %v35_v5 = vld [vmem:[%s4180_s0 + $0x10] sm:$0xff] }
   0x2   :  { %v33_v3 = vld [vmem:[%s4180_s0] sm:$0xff]  ;;  %2233 = vmatprep.subr.bf16.mxu1 %v3276_v0  ;;  %v36_v7 = vld [vmem:[%s4180_s0 + $0x18] sm:$0xff]  ;;  %v139_v9 = vld [vmem:[%s4181_s2 + $0x8] sm:$0xff] }
   0x3   :  { %v41_v6 = vpack.c.bf16 %v34_v4, %v33_v3  ;;  %v138_v8 = vld [vmem:[%s4181_s2] sm:$0xff]  ;;  %2234 = vmatpush3.bf16.msra.mxu1 %v3276_v0  ;;  %v42_v10 = vpack.c.bf16 %v36_v7, %v35_v5  ;;  %v140_v12 = vld [vmem:[%s4181_s2 + $0x10] sm:$0xff]  ;;  %v141_v13 = vld [vmem:[%s4181_s2 + $0x18] sm:$0xff] }
   0x4   :  { %v3525_v11 = vpack.c.bf16 %v139_v9, %v138_v8  ;;  %2862 = vmatprep.subr.bf16.mxu1 %v3445_v1  ;;  %v37_v14 = vld [vmem:[%s4180_s0 + $0x20] sm:$0xff]  ;;  %v38_v15 = vld [vmem:[%s4180_s0 + $0x28] sm:$0xff]  ;;  %v3545_v16 = vpack.c.bf16 %v141_v13, %v140_v12  ;;  %v39_v18 = vld [vmem:[%s4180_s0 + $0x30] sm:$0xff] }
   0x5   :  { %2235 = vmatprep.mubr.msk.bf16.mxu1 %vm60_vm1, %v41_v6  ;;  %v43_v17 = vpack.c.bf16 %v38_v15, %v37_v14  ;;  %v40_v19 = vld [vmem:[%s4180_s0 + $0x38] sm:$0xff]  ;;  %v142_v20 = vld [vmem:[%s4181_s2 + $0x20] sm:$0xff]  ;;  %v143_v21 = vld [vmem:[%s4181_s2 + $0x28] sm:$0xff] }
   0x6   :  { %2888 = vmatpush3.bf16.msra.mxu0 %v3525_v11  ;;  %2236 = vmatmul.mubr.msk.bf16.vlgmr.msra.gmra.mrb[0].mxu1 %vm60_vm1, %v42_v10  ;;  %v44_v22 = vpack.c.bf16 %v40_v19, %v39_v18  ;;  %v3564_v23 = vpack.c.bf16 %v143_v21, %v142_v20  ;;  %v144_v24 = vld [vmem:[%s4181_s2 + $0x30] sm:$0xff]  ;;  %v145_v25 = vld [vmem:[%s4181_s2 + $0x38] sm:$0xff]  ;;  %v146_v27 = vld [vmem:[%s4181_s2 + $0x40] sm:$0xff] }
   0x7   :  { %2889 = vmatprep.subr.bf16.mxu0 %v3445_v1  ;;  %2864 = vmatpush3.bf16.msra.mxu1 %v3525_v11  ;;  %v3577_v26 = vpack.c.bf16 %v145_v25, %v144_v24  ;;  %v147_v28 = vld [vmem:[%s4181_s2 + $0x48] sm:$0xff]  ;;  %v148_v30 = vld [vmem:[%s4181_s2 + $0x50] sm:$0xff]  ;;  %v149_v31 = vld [vmem:[%s4181_s2 + $0x58] sm:$0xff] }
   0x8   :  { %2865 = vmatprep.subr.bf16.mxu1 %v3445_v1  ;;  %2239 = vmatprep.mubr.msk.bf16.mxu1 %vm60_vm1, %v43_v17  ;;  %v3591_v29 = vpack.c.bf16 %v147_v28, %v146_v27  ;;  %v3603_v32 = vpack.c.bf16 %v149_v31, %v148_v30  ;;  %v150_v33 = vld [vmem:[%s4181_s2 + $0x60] sm:$0xff]  ;;  %v151_v34 = vld [vmem:[%s4181_s2 + $0x68] sm:$0xff]  ;;  %v152_v36 = vld [vmem:[%s4181_s2 + $0x70] sm:$0xff] }
   0x9   :  { %v3615_v35 = vpack.c.bf16 %v151_v34, %v150_v33  ;;  %v153_v37 = vld [vmem:[%s4181_s2 + $0x78] sm:$0xff]  ;;  %v1887_v39 = vld [vmem:[%s4182_s3] ss:$0 sm:$0xff]  ;;  %s3448_s3 = smov 32  }
   0xa   :  { %2891 = vmatpush3.bf16.msra.mxu0 %v3545_v16  ;;  %v3627_v38 = vpack.c.bf16 %v153_v37, %v152_v36 }
   0xb   :  { %2892 = vmatprep.subr.bf16.mxu0 %v3445_v1  ;;  %2867 = vmatpush3.bf16.msra.mxu1 %v3545_v16 }
   0xc   :  { %2868 = vmatprep.subr.bf16.mxu1 %v3445_v1 }
   0xe   :  { %2894 = vmatpush3.bf16.msra.mxu0 %v3564_v23  ;;  %2240 = vmatmul.mubr.msk.bf16.gmra.mrb[4].mxu1 %vm60_vm1, %v44_v22 }
   0xf   :  { %2895 = vmatprep.subr.bf16.mxu0 %v3445_v1  ;;  %2870 = vmatpush3.bf16.msra.mxu1 %v3564_v23 }
  0x10   :  { %2275 = vmatprep.mubr.msk.f32.mxu1 %vm3446_vm0, %v3447_v2  ;;  %2871 = vmatprep.subr.bf16.mxu1 %v3445_v1 }
  0x12   :  { %2897 = vmatpush3.bf16.msra.mxu0 %v3577_v26 }
  0x13   :  { %2898 = vmatprep.subr.bf16.mxu0 %v3445_v1  ;;  %2873 = vmatpush3.bf16.msra.mxu1 %v3577_v26 }
  0x14   :  { %2874 = vmatprep.subr.bf16.mxu1 %v3445_v1 }
  0x16   :  { %2900 = vmatpush3.bf16.msra.mxu0 %v3591_v29 }
  0x17   :  { %2901 = vmatprep.subr.bf16.mxu0 %v3445_v1  ;;  %2876 = vmatpush3.bf16.msra.mxu1 %v3591_v29 }
  0x18   :  { %2877 = vmatprep.subr.bf16.mxu1 %v3445_v1 }
  0x1a   :  { %2903 = vmatpush3.bf16.msra.mxu0 %v3603_v32 }
  0x1b   :  { %2904 = vmatprep.subr.bf16.mxu0 %v3445_v1  ;;  %2879 = vmatpush3.bf16.msra.mxu1 %v3603_v32 }
  0x1c   :  { %2880 = vmatprep.subr.bf16.mxu1 %v3445_v1 }
  0x1e   :  { %2906 = vmatpush3.bf16.msra.mxu0 %v3615_v35 }
  0x1f   :  { %2907 = vmatprep.subr.bf16.mxu0 %v3445_v1  ;;  %2882 = vmatpush3.bf16.msra.mxu1 %v3615_v35 }
  0x20   :  { %2883 = vmatprep.subr.bf16.mxu1 %v3445_v1 }
  0x22   :  { %2909 = vmatpush3.bf16.msra.mxu0 %v3627_v38 }
  0x23   :  { %2934 = vmatprep.subr.bf16.mxu0 %v3445_v1  ;;  %2885 = vmatpush3.bf16.msra.mxu1 %v3627_v38 }
  0x24   :  { %2910 = vmatprep.subr.bf16.mxu1 %v3445_v1 }
  0x26   :  { %2276 = vmatmul.mubr.f32.vlgmr.msra.gmra.mrb[8].mxu1 %v3447_v2 }
  0x27   :  { %2912 = vmatpush3.bf16.msra.mxu1 %v3525_v11  ;;  %2345 = vmatprep.mubr.msk.f32.mxu1 %vm3446_vm0, %v3447_v2 }
  0x28   :  { %2913 = vmatprep.subr.bf16.mxu1 %v3445_v1 }
  0x2b   :  { %2915 = vmatpush3.bf16.msra.mxu1 %v3545_v16 }
  0x2c   :  { %2916 = vmatprep.subr.bf16.mxu1 %v3445_v1 }
  0x2f   :  { %2918 = vmatpush3.bf16.msra.mxu1 %v3564_v23 }
  0x30   :  { %2919 = vmatprep.subr.bf16.mxu1 %v3445_v1 }
  0x33   :  { %2921 = vmatpush3.bf16.msra.mxu1 %v3577_v26 }
  0x34   :  { %2922 = vmatprep.subr.bf16.mxu1 %v3445_v1 }
  0x37   :  { %2924 = vmatpush3.bf16.msra.mxu1 %v3591_v29 }
  0x38   :  { %2925 = vmatprep.subr.bf16.mxu1 %v3445_v1 }
  0x3b   :  { %2927 = vmatpush3.bf16.msra.mxu1 %v3603_v32 }
  0x3c   :  { %2928 = vmatprep.subr.bf16.mxu1 %v3445_v1 }
  0x3f   :  { %2930 = vmatpush3.bf16.msra.mxu1 %v3615_v35 }
  0x40   :  { %2931 = vmatprep.subr.bf16.mxu1 %v3445_v1 }
  0x43   :  { %2933 = vmatpush3.bf16.msra.mxu1 %v3627_v38 }
  0x44   :  { %2958 = vmatprep.subr.bf16.mxu1 %v3445_v1 }
  0xd9   :  { %v2237_v40 = vpop.f32.mrb[0].mxu1 }
  0xda   :  { %v3656_v41 = vadd.f32 %v2237_v40, %v1887_v39  ;;  %v107_v42 = vpop.f32.mrb[1].mxu1 }
  0xdb   :  { %v2238_v43 = vpop.f32.mrb[2].mxu1  ;;  %v108_v55 = vadd.f32 %v1887_v39, %v107_v42 }
  0xdc   :  { %v3658_v44 = vadd.f32 %v2238_v43, %v1887_v39  ;;  %v110_v45 = vpop.f32.mrb[3].mxu1 }
  0xdd   :  { %v111_v46 = vadd.f32 %v1887_v39, %v110_v45 }
  0xe1   :  { %v2241_v47 = vpop.f32.mrb[4].mxu1 }
  0xe2   :  { %v3660_v48 = vadd.f32 %v2241_v47, %v1887_v39  ;;  %v123_v49 = vpop.f32.mrb[5].mxu1 }
  0xe3   :  { %v3662_v50 = vadd.f32 %v1887_v39, %v123_v49  ;;  %v2242_v51 = vpop.f32.mrb[6].mxu1 }
  0xe4   :  { %v3664_v52 = vadd.f32 %v2242_v51, %v1887_v39  ;;  %v126_v53 = vpop.f32.mrb[7].mxu1 }
  0xe5   :  { %v3666_v54 = vadd.f32 %v1887_v39, %v126_v53 }
  0xf9   :  { %v220_v56 = vpop.f32.mrb[8].mxu1 }
  0xfa   :  { %v224_v57 = vadd.f32 %v220_v56, %v108_v55  ;;  %v2277_v58 = vpop.f32.mrb[9].mxu1 }
  0xfc   :  { %v1893_v59 = vmul.f32 -1.442695, %v224_v57 }
  0xfe   :  { %3285 = vpow2.f32 %v1893_v59 }
 0x108   :  { %v3286_v60 = vpop.eup %3285 }
 0x109   :  { %v228_v61 = vadd.f32 1.0, %v3286_v60 }
 0x10b   :  { %3287 = vrcp.f32 %v228_v61 }
 0x10c   :  { %3289 = vtanh.f32 %v224_v57 }
 0x115   :  { %v3288_v62 = vpop.eup %3287 }
 0x116   :  { %236 = vrot.lane.b32.xlu1 %v3288_v62, %s3448_s3  ;;  %232 = vrot.lane.b32.xlu0 %v3288_v62, %s3449_s15  ;;  %v3290_v63 = vpop.eup %3289 }
 0x11a   :  { %234 = vrot.lane.b32.xlu0 %v3290_v63, %s3450_s16 }
 0x188   :  { %v233_v0 = vpop.permute.xlu0 %232  ;;  %v237_v8 = vpop.permute.xlu1 %236 }
 0x189   :  { %v238_v4 = vmul.f32 0.0, %v233_v0 }
 0x18c   :  { %v235_v3 = vpop.permute.xlu0 %234 }
 0x18d   :  { %v239_v5 = vmul.f32 %v3288_v62, %v235_v3 }
 0x18f   :  { %v240_v6 = vadd.f32 %v239_v5, %v238_v4 }
 0x191   :  { %3291 = vtanh.f32 %v240_v6 }
 0x19b   :  { %v3292_v7 = vpop.eup %3291 }
 0x19c   :  { %v242_v9 = vmul.f32 %v3292_v7, %v237_v8 }
 0x19e   :  { %2311 = vmatmul.mubr.f32.vlgmr.msra.gmra.mrb[0].mxu0 %v242_v9 }
 0x19f   :  { %2936 = vmatpush3.bf16.msra.mxu0 %v3525_v11  ;;  %2380 = vmatprep.mubr.msk.f32.mxu0 %vm3446_vm0, %v3447_v2 }
 0x1a0   :  { %2937 = vmatprep.subr.bf16.mxu0 %v3445_v1 }
 0x1a3   :  { %2939 = vmatpush3.bf16.msra.mxu0 %v3545_v16 }
 0x1a4   :  { %2940 = vmatprep.subr.bf16.mxu0 %v3445_v1 }
 0x1a7   :  { %2942 = vmatpush3.bf16.msra.mxu0 %v3564_v23 }
 0x1a8   :  { %2943 = vmatprep.subr.bf16.mxu0 %v3445_v1 }
 0x1ab   :  { %2945 = vmatpush3.bf16.msra.mxu0 %v3577_v26 }
 0x1ac   :  { %2946 = vmatprep.subr.bf16.mxu0 %v3445_v1 }
 0x1af   :  { %2948 = vmatpush3.bf16.msra.mxu0 %v3591_v29 }
 0x1b0   :  { %2949 = vmatprep.subr.bf16.mxu0 %v3445_v1 }
 0x1b3   :  { %2951 = vmatpush3.bf16.msra.mxu0 %v3603_v32 }
 0x1b4   :  { %2952 = vmatprep.subr.bf16.mxu0 %v3445_v1 }
 0x1b7   :  { %2954 = vmatpush3.bf16.msra.mxu0 %v3615_v35 }
 0x1b8   :  { %2955 = vmatprep.subr.bf16.mxu0 %v3445_v1 }
 0x1bb   :  { %2957 = vmatpush3.bf16.msra.mxu0 %v3627_v38 }
 0x1bc   :  { %2982 = vmatprep.subr.bf16.mxu0 %v3445_v1 }
 0x271   :  { %v309_v10 = vpop.f32.mrb[0].mxu0 }
 0x272   :  { %v313_v12 = vadd.f32 %v309_v10, %v111_v46  ;;  %v2312_v13 = vpop.f32.mrb[1].mxu0 }
 0x274   :  { %v1894_v14 = vmul.f32 -1.442695, %v313_v12  ;;  %3293 = vtanh.f32 %v313_v12 }
 0x276   :  { %3295 = vpow2.f32 %v1894_v14 }
 0x27e   :  { %v3294_v15 = vpop.eup %3293 }
 0x27f   :  { %323 = vrot.lane.b32.xlu0 %v3294_v15, %s3450_s16 }
 0x280   :  { %v3296_v17 = vpop.eup %3295 }
 0x281   :  { %v317_v18 = vadd.f32 1.0, %v3296_v17 }
 0x283   :  { %3297 = vrcp.f32 %v317_v18 }
 0x28d   :  { %v3298_v19 = vpop.eup %3297 }
 0x28e   :  { %321 = vrot.lane.b32.xlu1 %v3298_v19, %s3449_s15 }
 0x292   :  { %325 = vrot.lane.b32.xlu1 %v3298_v19, %s3448_s3 }
 0x2f1   :  { %v324_v20 = vpop.permute.xlu0 %323 }
 0x2f2   :  { %v328_v22 = vmul.f32 %v3298_v19, %v324_v20 }
 0x300   :  { %v322_v21 = vpop.permute.xlu1 %321 }
 0x301   :  { %v327_v24 = vmul.f32 %v322_v21, %v240_v6 }
 0x303   :  { %v329_v25 = vadd.f32 %v328_v22, %v327_v24 }
 0x304   :  { %v326_v28 = vpop.permute.xlu1 %325 }
 0x305   :  { %3299 = vtanh.f32 %v329_v25 }
 0x30f   :  { %v3300_v27 = vpop.eup %3299 }
 0x310   :  { %v331_v30 = vmul.f32 %v3300_v27, %v326_v28 }
 0x312   :  { %2346 = vmatmul.mubr.f32.vlgmr.msra.gmra.mrb[10].mxu1 %v331_v30 }
 0x313   :  { %2960 = vmatpush3.bf16.msra.mxu1 %v3525_v11  ;;  %2415 = vmatprep.mubr.msk.f32.mxu1 %vm3446_vm0, %v3447_v2 }
 0x314   :  { %2961 = vmatprep.subr.bf16.mxu1 %v3445_v1 }
 0x317   :  { %2963 = vmatpush3.bf16.msra.mxu1 %v3545_v16 }
 0x318   :  { %2964 = vmatprep.subr.bf16.mxu1 %v3445_v1 }
 0x31b   :  { %2966 = vmatpush3.bf16.msra.mxu1 %v3564_v23 }
 0x31c   :  { %2967 = vmatprep.subr.bf16.mxu1 %v3445_v1 }
 0x31f   :  { %2969 = vmatpush3.bf16.msra.mxu1 %v3577_v26 }
 0x320   :  { %2970 = vmatprep.subr.bf16.mxu1 %v3445_v1 }
 0x323   :  { %2972 = vmatpush3.bf16.msra.mxu1 %v3591_v29 }
 0x324   :  { %2973 = vmatprep.subr.bf16.mxu1 %v3445_v1 }
 0x327   :  { %2975 = vmatpush3.bf16.msra.mxu1 %v3603_v32 }
 0x328   :  { %2976 = vmatprep.subr.bf16.mxu1 %v3445_v1 }
 0x32b   :  { %2978 = vmatpush3.bf16.msra.mxu1 %v3615_v35 }
 0x32c   :  { %2979 = vmatprep.subr.bf16.mxu1 %v3445_v1 }
 0x32f   :  { %2981 = vmatpush3.bf16.msra.mxu1 %v3627_v38 }
 0x330   :  { %3006 = vmatprep.subr.bf16.mxu1 %v3445_v1 }
 0x3e5   :  { %v398_v31 = vpop.f32.mrb[10].mxu1 }
 0x3e6   :  { %v402_v33 = vadd.f32 %v398_v31, %v3656_v41  ;;  %v2347_v34 = vpop.f32.mrb[11].mxu1 }
 0x3e8   :  { %v1895_v36 = vmul.f32 -1.442695, %v402_v33  ;;  %3301 = vtanh.f32 %v402_v33 }
 0x3ea   :  { %3303 = vpow2.f32 %v1895_v36 }
 0x3f2   :  { %v3302_v37 = vpop.eup %3301 }
 0x3f3   :  { %412 = vrot.lane.b32.xlu1 %v3302_v37, %s3450_s16 }
 0x3f4   :  { %v3304_v39 = vpop.eup %3303 }
 0x3f5   :  { %v406_v40 = vadd.f32 1.0, %v3304_v39 }
 0x3f7   :  { %3305 = vrcp.f32 %v406_v40 }
 0x401   :  { %v3306_v42 = vpop.eup %3305 }
 0x402   :  { %410 = vrot.lane.b32.xlu0 %v3306_v42, %s3449_s15 }
 0x406   :  { %414 = vrot.lane.b32.xlu0 %v3306_v42, %s3448_s3 }
 0x465   :  { %v413_v43 = vpop.permute.xlu1 %412 }
 0x466   :  { %v417_v46 = vmul.f32 %v3306_v42, %v413_v43 }
 0x474   :  { %v411_v45 = vpop.permute.xlu0 %410 }
 0x475   :  { %v416_v47 = vmul.f32 %v411_v45, %v329_v25 }
 0x477   :  { %v418_v41 = vadd.f32 %v417_v46, %v416_v47 }
 0x478   :  { %v415_v51 = vpop.permute.xlu0 %414 }
 0x479   :  { %3307 = vtanh.f32 %v418_v41 }
 0x483   :  { %v3308_v49 = vpop.eup %3307 }
 0x484   :  { %v420_v53 = vmul.f32 %v3308_v49, %v415_v51 }
 0x486   :  { %2381 = vmatmul.mubr.f32.vlgmr.msra.gmra.mrb[2].mxu0 %v420_v53 }
 0x487   :  { %2984 = vmatpush3.bf16.msra.mxu0 %v3525_v11  ;;  %2450 = vmatprep.mubr.msk.f32.mxu0 %vm3446_vm0, %v3447_v2 }
 0x488   :  { %2985 = vmatprep.subr.bf16.mxu0 %v3445_v1 }
 0x48b   :  { %2987 = vmatpush3.bf16.msra.mxu0 %v3545_v16 }
 0x48c   :  { %2988 = vmatprep.subr.bf16.mxu0 %v3445_v1 }
 0x48f   :  { %2990 = vmatpush3.bf16.msra.mxu0 %v3564_v23 }
 0x490   :  { %2991 = vmatprep.subr.bf16.mxu0 %v3445_v1 }
 0x493   :  { %2993 = vmatpush3.bf16.msra.mxu0 %v3577_v26 }
 0x494   :  { %2994 = vmatprep.subr.bf16.mxu0 %v3445_v1 }
 0x497   :  { %2996 = vmatpush3.bf16.msra.mxu0 %v3591_v29 }
 0x498   :  { %2997 = vmatprep.subr.bf16.mxu0 %v3445_v1 }
 0x49b   :  { %2999 = vmatpush3.bf16.msra.mxu0 %v3603_v32 }
 0x49c   :  { %3000 = vmatprep.subr.bf16.mxu0 %v3445_v1 }
 0x49f   :  { %3002 = vmatpush3.bf16.msra.mxu0 %v3615_v35 }
 0x4a0   :  { %3003 = vmatprep.subr.bf16.mxu0 %v3445_v1 }
 0x4a3   :  { %3005 = vmatpush3.bf16.msra.mxu0 %v3627_v38 }
 0x4a4   :  { %3030 = vmatprep.subr.bf16.mxu0 %v3445_v1 }
 0x559   :  { %v487_v55 = vpop.f32.mrb[2].mxu0 }
 0x55a   :  { %v491_v56 = vadd.f32 %v487_v55, %v3658_v44  ;;  %v2382_v57 = vpop.f32.mrb[3].mxu0 }
 0x55c   :  { %v1896_v58 = vmul.f32 -1.442695, %v491_v56  ;;  %3309 = vtanh.f32 %v491_v56 }
 0x55e   :  { %3311 = vpow2.f32 %v1896_v58  ;;  %v866_v58 = vld [vmem:[%s4183_s4] sm:$0xff] }
 0x566   :  { %v3310_v59 = vpop.eup %3309 }
 0x567   :  { %501 = vrot.lane.b32.xlu0 %v3310_v59, %s3450_s16  ;;  %v867_v59 = vld [vmem:[%s4183_s4 + $0x8] sm:$0xff] }
 0x568   :  { %v3312_v60 = vpop.eup %3311 }
 0x569   :  { %v495_v61 = vadd.f32 1.0, %v3312_v60 }
 0x56b   :  { %3313 = vrcp.f32 %v495_v61  ;;  %v3055_v61 = vpack.c.bf16 %v867_v59, %v866_v58 }
 0x575   :  { %v3314_v62 = vpop.eup %3313 }
 0x576   :  { %499 = vrot.lane.b32.xlu1 %v3314_v62, %s3449_s15 }
 0x57a   :  { %503 = vrot.lane.b32.xlu1 %v3314_v62, %s3448_s3 }
 0x5d9   :  { %v502_v63 = vpop.permute.xlu0 %501 }
 0x5da   :  { %v506_v3 = vmul.f32 %v3314_v62, %v502_v63  ;;  %v959_v62 = vld [vmem:[%s4184_s5] sm:$0xff]  ;;  %v960_v63 = vld [vmem:[%s4184_s5 + $0x8] sm:$0xff] }
 0x5e8   :  { %v500_v0 = vpop.permute.xlu1 %499 }
 0x5e9   :  { %v505_v4 = vmul.f32 %v500_v0, %v418_v41 }
 0x5eb   :  { %v507_v44 = vadd.f32 %v506_v3, %v505_v4  ;;  %v3804_v4 = vpack.c.bf16 %v960_v63, %v959_v62  ;;  %v1901_v62 = vld [vmem:[%s4185_s6] ss:$0 sm:$0xff] }
 0x5ec   :  { %v504_v6 = vpop.permute.xlu1 %503 }
 0x5ed   :  { %3315 = vtanh.f32 %v507_v44 }
 0x5f7   :  { %v3316_v5 = vpop.eup %3315 }
 0x5f8   :  { %v509_v7 = vmul.f32 %v3316_v5, %v504_v6  ;;  %v869_v5 = vld [vmem:[%s4183_s4 + $0x18] sm:$0xff]  ;;  %v961_v6 = vld [vmem:[%s4184_s5 + $0x10] sm:$0xff] }
 0x5fa   :  { %2416 = vmatmul.mubr.f32.vlgmr.msra.gmra.mrb[12].mxu1 %v509_v7 }
 0x5fb   :  { %3008 = vmatpush3.bf16.msra.mxu1 %v3525_v11  ;;  %2485 = vmatprep.mubr.msk.f32.mxu1 %vm3446_vm0, %v3447_v2 }
 0x5fc   :  { %3009 = vmatprep.subr.bf16.mxu1 %v3445_v1 }
 0x5ff   :  { %3011 = vmatpush3.bf16.msra.mxu1 %v3545_v16 }
 0x600   :  { %3012 = vmatprep.subr.bf16.mxu1 %v3445_v1 }
 0x603   :  { %3014 = vmatpush3.bf16.msra.mxu1 %v3564_v23 }
 0x604   :  { %3015 = vmatprep.subr.bf16.mxu1 %v3445_v1 }
 0x607   :  { %3017 = vmatpush3.bf16.msra.mxu1 %v3577_v26 }
 0x608   :  { %3018 = vmatprep.subr.bf16.mxu1 %v3445_v1 }
 0x60b   :  { %3020 = vmatpush3.bf16.msra.mxu1 %v3591_v29 }
 0x60c   :  { %3021 = vmatprep.subr.bf16.mxu1 %v3445_v1 }
 0x60f   :  { %3023 = vmatpush3.bf16.msra.mxu1 %v3603_v32 }
 0x610   :  { %3024 = vmatprep.subr.bf16.mxu1 %v3445_v1 }
 0x613   :  { %3026 = vmatpush3.bf16.msra.mxu1 %v3615_v35 }
 0x614   :  { %3027 = vmatprep.subr.bf16.mxu1 %v3445_v1 }
 0x617   :  { %3029 = vmatpush3.bf16.msra.mxu1 %v3627_v38 }
 0x618   :  { %3054 = vmatprep.subr.bf16.mxu1 %v3445_v1 }
 0x6cd   :  { %v576_v8 = vpop.f32.mrb[12].mxu1 }
 0x6ce   :  { %v580_v9 = vadd.f32 %v576_v8, %v3662_v50  ;;  %v2417_v10 = vpop.f32.mrb[13].mxu1 }
 0x6cf   :  { %v870_v10 = vld [vmem:[%s4183_s4 + $0x20] sm:$0xff] }
 0x6d0   :  { %v1897_v12 = vmul.f32 -1.442695, %v580_v9  ;;  %3317 = vtanh.f32 %v580_v9 }
 0x6d2   :  { %3319 = vpow2.f32 %v1897_v12  ;;  %v871_v12 = vld [vmem:[%s4183_s4 + $0x28] sm:$0xff] }
 0x6da   :  { %v3318_v13 = vpop.eup %3317 }
 0x6db   :  { %590 = vrot.lane.b32.xlu1 %v3318_v13, %s3450_s16  ;;  %v963_v13 = vld [vmem:[%s4184_s5 + $0x20] sm:$0xff] }
 0x6dc   :  { %v3320_v14 = vpop.eup %3319 }
 0x6dd   :  { %v584_v15 = vadd.f32 1.0, %v3320_v14  ;;  %v964_v14 = vld [vmem:[%s4184_s5 + $0x28] sm:$0xff] }
 0x6df   :  { %3321 = vrcp.f32 %v584_v15  ;;  %v3061_v15 = vpack.c.bf16 %v871_v12, %v870_v10 }
 0x6e9   :  { %v3322_v17 = vpop.eup %3321 }
 0x6ea   :  { %588 = vrot.lane.b32.xlu0 %v3322_v17, %s3449_s15 }
 0x6ee   :  { %592 = vrot.lane.b32.xlu0 %v3322_v17, %s3448_s3 }
 0x74d   :  { %v591_v18 = vpop.permute.xlu1 %590 }
 0x74e   :  { %v595_v20 = vmul.f32 %v3322_v17, %v591_v18  ;;  %v3837_v17 = vpack.c.bf16 %v964_v14, %v963_v13  ;;  %v872_v18 = vld [vmem:[%s4183_s4 + $0x30] sm:$0xff] }
 0x75c   :  { %v589_v19 = vpop.permute.xlu0 %588 }
 0x75d   :  { %v594_v21 = vmul.f32 %v589_v19, %v507_v44  ;;  %v868_v44 = vld [vmem:[%s4183_s4 + $0x10] sm:$0xff]  ;;  %v873_v19 = vld [vmem:[%s4183_s4 + $0x38] sm:$0xff] }
 0x75e   :  { %v3058_v7 = vpack.c.bf16 %v869_v5, %v868_v44 }
 0x75f   :  { %v596_v50 = vadd.f32 %v595_v20, %v594_v21  ;;  %v965_v20 = vld [vmem:[%s4184_s5 + $0x30] sm:$0xff]  ;;  %v966_v21 = vld [vmem:[%s4184_s5 + $0x38] sm:$0xff] }
 0x760   :  { %v593_v24 = vpop.permute.xlu0 %592 }
 0x761   :  { %3323 = vtanh.f32 %v596_v50 }
 0x76b   :  { %v3324_v22 = vpop.eup %3323 }
 0x76c   :  { %v598_v25 = vmul.f32 %v3324_v22, %v593_v24  ;;  %v3854_v22 = vpack.c.bf16 %v966_v21, %v965_v20 }
 0x76e   :  { %2451 = vmatmul.mubr.f32.vlgmr.msra.gmra.mrb[4].mxu0 %v598_v25 }
 0x76f   :  { %3032 = vmatpush3.bf16.msra.mxu0 %v3525_v11  ;;  %2520 = vmatprep.mubr.msk.f32.mxu0 %vm3446_vm0, %v3447_v2 }
 0x770   :  { %3033 = vmatprep.subr.bf16.mxu0 %v3445_v1 }
 0x773   :  { %3035 = vmatpush3.bf16.msra.mxu0 %v3545_v16 }
 0x774   :  { %3036 = vmatprep.subr.bf16.mxu0 %v3445_v1 }
 0x777   :  { %3038 = vmatpush3.bf16.msra.mxu0 %v3564_v23 }
 0x778   :  { %3039 = vmatprep.subr.bf16.mxu0 %v3445_v1 }
 0x77b   :  { %3041 = vmatpush3.bf16.msra.mxu0 %v3577_v26 }
 0x77c   :  { %3042 = vmatprep.subr.bf16.mxu0 %v3445_v1 }
 0x77f   :  { %3044 = vmatpush3.bf16.msra.mxu0 %v3591_v29 }
 0x780   :  { %3045 = vmatprep.subr.bf16.mxu0 %v3445_v1 }
 0x783   :  { %3047 = vmatpush3.bf16.msra.mxu0 %v3603_v32 }
 0x784   :  { %3048 = vmatprep.subr.bf16.mxu0 %v3445_v1 }
 0x787   :  { %3050 = vmatpush3.bf16.msra.mxu0 %v3615_v35 }
 0x788   :  { %3051 = vmatprep.subr.bf16.mxu0 %v3445_v1 }
 0x78b   :  { %3053 = vmatpush3.bf16.msra.mxu0 %v3627_v38 }
 0x78c   :  { %3078 = vmatprep.subr.bf16.mxu0 %v3445_v1 }
 0x841   :  { %v665_v11 = vpop.f32.mrb[4].mxu0 }
 0x842   :  { %v669_v16 = vadd.f32 %v665_v11, %v3666_v54  ;;  %v2452_v23 = vpop.f32.mrb[5].mxu0  ;;  %v874_v11 = vld [vmem:[%s4183_s4 + $0x40] sm:$0xff] }
 0x844   :  { %v1898_v26 = vmul.f32 -1.442695, %v669_v16  ;;  %3325 = vtanh.f32 %v669_v16  ;;  %v875_v16 = vld [vmem:[%s4183_s4 + $0x48] sm:$0xff] }
 0x846   :  { %3327 = vpow2.f32 %v1898_v26  ;;  %v3067_v26 = vpack.c.bf16 %v875_v16, %v874_v11 }
 0x84e   :  { %v3326_v29 = vpop.eup %3325 }
 0x84f   :  { %679 = vrot.lane.b32.xlu0 %v3326_v29, %s3450_s16  ;;  %v967_v29 = vld [vmem:[%s4184_s5 + $0x40] sm:$0xff] }
 0x850   :  { %v3328_v32 = vpop.eup %3327 }
 0x851   :  { %v673_v27 = vadd.f32 1.0, %v3328_v32  ;;  %v968_v32 = vld [vmem:[%s4184_s5 + $0x48] sm:$0xff] }
 0x853   :  { %3329 = vrcp.f32 %v673_v27  ;;  %v3873_v27 = vpack.c.bf16 %v968_v32, %v967_v29 }
 0x85d   :  { %v3330_v35 = vpop.eup %3329 }
 0x85e   :  { %677 = vrot.lane.b32.xlu1 %v3330_v35, %s3449_s15 }
 0x862   :  { %681 = vrot.lane.b32.xlu1 %v3330_v35, %s3448_s3 }
 0x8c1   :  { %v680_v38 = vpop.permute.xlu0 %679 }
 0x8c2   :  { %v684_v30 = vmul.f32 %v3330_v35, %v680_v38  ;;  %v876_v35 = vld [vmem:[%s4183_s4 + $0x50] sm:$0xff]  ;;  %v877_v38 = vld [vmem:[%s4183_s4 + $0x58] sm:$0xff] }
 0x8d0   :  { %v678_v28 = vpop.permute.xlu1 %677 }
 0x8d1   :  { %v683_v31 = vmul.f32 %v678_v28, %v596_v50  ;;  %v3064_v50 = vpack.c.bf16 %v873_v19, %v872_v18  ;;  %v3070_v28 = vpack.c.bf16 %v877_v38, %v876_v35 }
 0x8d3   :  { %v685_v54 = vadd.f32 %v684_v30, %v683_v31  ;;  %v969_v30 = vld [vmem:[%s4184_s5 + $0x50] sm:$0xff]  ;;  %v970_v31 = vld [vmem:[%s4184_s5 + $0x58] sm:$0xff] }
 0x8d4   :  { %v682_v34 = vpop.permute.xlu1 %681 }
 0x8d5   :  { %3331 = vtanh.f32 %v685_v54 }
 0x8df   :  { %v3332_v33 = vpop.eup %3331 }
 0x8e0   :  { %v687_v36 = vmul.f32 %v3332_v33, %v682_v34  ;;  %v878_v33 = vld [vmem:[%s4183_s4 + $0x60] sm:$0xff]  ;;  %v879_v34 = vld [vmem:[%s4183_s4 + $0x68] sm:$0xff] }
 0x8e2   :  { %2486 = vmatmul.mubr.f32.vlgmr.msra.gmra.mrb[14].mxu1 %v687_v36  ;;  %v3073_v36 = vpack.c.bf16 %v879_v34, %v878_v33 }
 0x8e3   :  { %2555 = vmatprep.mubr.msk.f32.mxu1 %vm3446_vm0, %v3447_v2  ;;  %3056 = vmatpush3.bf16.msra.mxu1 %v3055_v61 }
 0x8e4   :  { %3057 = vmatprep.subr.bf16.mxu1 %v3445_v1 }
 0x8e7   :  { %3059 = vmatpush3.bf16.msra.mxu1 %v3058_v7 }
 0x8e8   :  { %3060 = vmatprep.subr.bf16.mxu1 %v3445_v1 }
 0x8eb   :  { %3062 = vmatpush3.bf16.msra.mxu1 %v3061_v15 }
 0x8ec   :  { %3063 = vmatprep.subr.bf16.mxu1 %v3445_v1 }
 0x8ef   :  { %3065 = vmatpush3.bf16.msra.mxu1 %v3064_v50 }
 0x8f0   :  { %3066 = vmatprep.subr.bf16.mxu1 %v3445_v1 }
 0x8f3   :  { %3068 = vmatpush3.bf16.msra.mxu1 %v3067_v26 }
 0x8f4   :  { %3069 = vmatprep.subr.bf16.mxu1 %v3445_v1 }
 0x8f7   :  { %3071 = vmatpush3.bf16.msra.mxu1 %v3070_v28 }
 0x8f8   :  { %3072 = vmatprep.subr.bf16.mxu1 %v3445_v1 }
 0x8fb   :  { %3074 = vmatpush3.bf16.msra.mxu1 %v3073_v36 }
 0x8fc   :  { %3075 = vmatprep.subr.bf16.mxu1 %v3445_v1 }
 0x9b5   :  { %v754_v37 = vpop.f32.mrb[14].mxu1 }
 0x9b6   :  { %v758_v39 = vadd.f32 %v754_v37, %v3660_v48  ;;  %v2487_v40 = vpop.f32.mrb[15].mxu1  ;;  %v971_v37 = vld [vmem:[%s4184_s5 + $0x60] sm:$0xff] }
 0x9b8   :  { %v1899_v42 = vmul.f32 -1.442695, %v758_v39  ;;  %3333 = vtanh.f32 %v758_v39  ;;  %v972_v39 = vld [vmem:[%s4184_s5 + $0x68] sm:$0xff] }
 0x9b9   :  { %v3907_v40 = vpack.c.bf16 %v972_v39, %v971_v37 }
 0x9ba   :  { %3335 = vpow2.f32 %v1899_v42  ;;  %v880_v42 = vld [vmem:[%s4183_s4 + $0x70] sm:$0xff] }
 0x9c2   :  { %v3334_v43 = vpop.eup %3333 }
 0x9c3   :  { %768 = vrot.lane.b32.xlu1 %v3334_v43, %s3450_s16  ;;  %v881_v43 = vld [vmem:[%s4183_s4 + $0x78] sm:$0xff] }
 0x9c4   :  { %v3336_v45 = vpop.eup %3335 }
 0x9c5   :  { %v762_v46 = vadd.f32 1.0, %v3336_v45 }
 0x9c7   :  { %3337 = vrcp.f32 %v762_v46  ;;  %v3076_v46 = vpack.c.bf16 %v881_v43, %v880_v42 }
 0x9c9   :  { %3077 = vmatpush3.bf16.msra.mxu1 %v3076_v46 }
 0x9ca   :  { %3102 = vmatprep.subr.bf16.mxu1 %v3445_v1 }
 0x9d1   :  { %v3338_v47 = vpop.eup %3337 }
 0x9d2   :  { %766 = vrot.lane.b32.xlu0 %v3338_v47, %s3449_s15 }
 0x9d6   :  { %770 = vrot.lane.b32.xlu0 %v3338_v47, %s3448_s3 }
 0xa35   :  { %v769_v41 = vpop.permute.xlu1 %768 }
 0xa36   :  { %v773_v51 = vmul.f32 %v3338_v47, %v769_v41  ;;  %v973_v47 = vld [vmem:[%s4184_s5 + $0x70] sm:$0xff]  ;;  %v974_v41 = vld [vmem:[%s4184_s5 + $0x78] sm:$0xff] }
 0xa44   :  { %v767_v49 = vpop.permute.xlu0 %766 }
 0xa45   :  { %v772_v53 = vmul.f32 %v767_v49, %v685_v54  ;;  %v3890_v54 = vpack.c.bf16 %v970_v31, %v969_v30  ;;  %v3925_v49 = vpack.c.bf16 %v974_v41, %v973_v47 }
 0xa47   :  { %v3786_v48 = vadd.f32 %v773_v51, %v772_v53 }
 0xa48   :  { %v771_v56 = vpop.permute.xlu0 %770 }
 0xa49   :  { %3339 = vtanh.f32 %v3786_v48 }
 0xa53   :  { %v3340_v55 = vpop.eup %3339 }
 0xa54   :  { %v776_v57 = vmul.f32 %v3340_v55, %v771_v56 }
 0xa56   :  { %2521 = vmatmul.mubr.f32.vlgmr.msra.gmra.mrb[6].mxu0 %v776_v57 }
 0xa57   :  { %2590 = vmatprep.mubr.msk.f32.mxu0 %vm3446_vm0, %v3447_v2  ;;  %3080 = vmatpush3.bf16.msra.mxu0 %v3804_v4 }
 0xa58   :  { %3081 = vmatprep.subr.bf16.mxu0 %v3445_v1 }
 0xb29   :  { %v843_v60 = vpop.f32.mrb[6].mxu0 }
 0xb2a   :  { %v847_v0 = vadd.f32 %v843_v60, %v3664_v52  ;;  %v2522_v3 = vpop.f32.mrb[7].mxu0  ;;  %v962_v52 = vld [vmem:[%s4184_s5 + $0x18] sm:$0xff] }
 0xb2b   :  { %v3820_v9 = vpack.c.bf16 %v962_v52, %v961_v6 }
 0xb2c   :  { %v1900_v8 = vmul.f32 -1.442695, %v847_v0  ;;  %3341 = vtanh.f32 %v847_v0 }
 0xb2d   :  { %3083 = vmatpush3.bf16.msra.mxu0 %v3820_v9 }
 0xb2e   :  { %3343 = vpow2.f32 %v1900_v8  ;;  %3084 = vmatprep.subr.bf16.mxu0 %v3445_v1 }
 0xb31   :  { %3086 = vmatpush3.bf16.msra.mxu0 %v3837_v17 }
 0xb32   :  { %3087 = vmatprep.subr.bf16.mxu0 %v3445_v1 }
 0xb35   :  { %3089 = vmatpush3.bf16.msra.mxu0 %v3854_v22 }
 0xb36   :  { %v3342_v24 = vpop.eup %3341  ;;  %3090 = vmatprep.subr.bf16.mxu0 %v3445_v1 }
 0xb37   :  { %857 = vrot.lane.b32.xlu0 %v3342_v24, %s3450_s16 }
 0xb38   :  { %v3344_v25 = vpop.eup %3343 }
 0xb39   :  { %v851_v23 = vadd.f32 1.0, %v3344_v25  ;;  %3092 = vmatpush3.bf16.msra.mxu0 %v3873_v27 }
 0xb3a   :  { %3093 = vmatprep.subr.bf16.mxu0 %v3445_v1 }
 0xb3b   :  { %3345 = vrcp.f32 %v851_v23 }
 0xb3d   :  { %3095 = vmatpush3.bf16.msra.mxu0 %v3890_v54 }
 0xb3e   :  { %3096 = vmatprep.subr.bf16.mxu0 %v3445_v1 }
 0xb41   :  { %3098 = vmatpush3.bf16.msra.mxu0 %v3907_v40 }
 0xb42   :  { %3099 = vmatprep.subr.bf16.mxu0 %v3445_v1 }
 0xb45   :  { %v3346_v45 = vpop.eup %3345  ;;  %3101 = vmatpush3.bf16.msra.mxu0 %v3925_v49 }
 0xb46   :  { %855 = vrot.lane.b32.xlu1 %v3346_v45, %s3449_s15  ;;  %3126 = vmatprep.subr.bf16.mxu0 %v3445_v1 }
 0xb48   :  { %2591 = vmatmul.mubr.f32.vlgmr.msra.gmra.mrb[8].mxu0 %v3447_v2 }
 0xb49   :  { %3128 = vmatpush3.bf16.msra.mxu0 %v3804_v4  ;;  %2660 = vmatprep.mubr.msk.f32.mxu0 %vm3446_vm0, %v3447_v2 }
 0xb4a   :  { %859 = vrot.lane.b32.xlu1 %v3346_v45, %s3448_s3  ;;  %3129 = vmatprep.subr.bf16.mxu0 %v3445_v1 }
 0xb4d   :  { %3131 = vmatpush3.bf16.msra.mxu0 %v3820_v9 }
 0xb4e   :  { %3132 = vmatprep.subr.bf16.mxu0 %v3445_v1 }
 0xb51   :  { %3134 = vmatpush3.bf16.msra.mxu0 %v3837_v17 }
 0xb52   :  { %3135 = vmatprep.subr.bf16.mxu0 %v3445_v1 }
 0xb55   :  { %3137 = vmatpush3.bf16.msra.mxu0 %v3854_v22 }
 0xb56   :  { %3138 = vmatprep.subr.bf16.mxu0 %v3445_v1 }
 0xb59   :  { %3140 = vmatpush3.bf16.msra.mxu0 %v3873_v27 }
 0xb5a   :  { %3141 = vmatprep.subr.bf16.mxu0 %v3445_v1 }
 0xb5d   :  { %3143 = vmatpush3.bf16.msra.mxu0 %v3890_v54 }
 0xb5e   :  { %3144 = vmatprep.subr.bf16.mxu0 %v3445_v1 }
 0xb61   :  { %3146 = vmatpush3.bf16.msra.mxu0 %v3907_v40 }
 0xb62   :  { %3147 = vmatprep.subr.bf16.mxu0 %v3445_v1 }
 0xb65   :  { %3149 = vmatpush3.bf16.msra.mxu0 %v3925_v49 }
 0xb66   :  { %3174 = vmatprep.subr.bf16.mxu0 %v3445_v1 }
 0xba9   :  { %v858_v51 = vpop.permute.xlu0 %857 }
 0xbaa   :  { %v862_v55 = vmul.f32 %v3346_v45, %v858_v51 }
 0xbb8   :  { %v856_v53 = vpop.permute.xlu1 %855 }
 0xbb9   :  { %v861_v56 = vmul.f32 %v856_v53, %v3786_v48 }
 0xbbb   :  { %v863_v57 = vadd.f32 %v862_v55, %v861_v56 }
 0xbbc   :  { %v860_v59 = vpop.permute.xlu1 %859 }
 0xbbd   :  { %3347 = vtanh.f32 %v863_v57 }
 0xbc7   :  { %v3348_v58 = vpop.eup %3347 }
 0xbc8   :  { %v865_v60 = vmul.f32 %v3348_v58, %v860_v59 }
 0xbca   :  { %2556 = vmatmul.mubr.f32.vlgmr.msra.gmra.mrb[16].mxu1 %v865_v60 }
 0xbcb   :  { %3104 = vmatpush3.bf16.msra.mxu1 %v3804_v4  ;;  %2625 = vmatprep.mubr.msk.f32.mxu1 %vm3446_vm0, %v3447_v2 }
 0xbcc   :  { %3105 = vmatprep.subr.bf16.mxu1 %v3445_v1 }
 0xbcf   :  { %3107 = vmatpush3.bf16.msra.mxu1 %v3820_v9 }
 0xbd0   :  { %3108 = vmatprep.subr.bf16.mxu1 %v3445_v1 }
 0xbd3   :  { %3110 = vmatpush3.bf16.msra.mxu1 %v3837_v17 }
 0xbd4   :  { %3111 = vmatprep.subr.bf16.mxu1 %v3445_v1 }
 0xbd7   :  { %3113 = vmatpush3.bf16.msra.mxu1 %v3854_v22 }
 0xbd8   :  { %3114 = vmatprep.subr.bf16.mxu1 %v3445_v1 }
 0xbdb   :  { %3116 = vmatpush3.bf16.msra.mxu1 %v3873_v27 }
 0xbdc   :  { %3117 = vmatprep.subr.bf16.mxu1 %v3445_v1 }
 0xbdf   :  { %3119 = vmatpush3.bf16.msra.mxu1 %v3890_v54 }
 0xbe0   :  { %3120 = vmatprep.subr.bf16.mxu1 %v3445_v1 }
 0xbe3   :  { %3122 = vmatpush3.bf16.msra.mxu1 %v3907_v40 }
 0xbe4   :  { %3123 = vmatprep.subr.bf16.mxu1 %v3445_v1 }
 0xbe7   :  { %3125 = vmatpush3.bf16.msra.mxu1 %v3925_v49 }
 0xbe8   :  { %3150 = vmatprep.subr.bf16.mxu1 %v3445_v1 }
 0xc1b   :  { %v1041_v48 = vpop.f32.mrb[8].mxu0 }
 0xc1c   :  { %v2592_v61 = vpop.f32.mrb[9].mxu0 }
 0xc9d   :  { %v955_v63 = vpop.f32.mrb[16].mxu1 }
 0xc9e   :  { %v3972_v0 = vadd.f32 %v1901_v62, %v955_v63  ;;  %v2557_v3 = vpop.f32.mrb[17].mxu1 }
 0xca0   :  { %v1045_v44 = vadd.f32 %v1041_v48, %v3972_v0 }
 0xca2   :  { %v1902_v5 = vmul.f32 -1.442695, %v1045_v44  ;;  %3349 = vtanh.f32 %v1045_v44 }
 0xca4   :  { %3351 = vpow2.f32 %v1902_v5 }
 0xcac   :  { %v3350_v6 = vpop.eup %3349 }
 0xcad   :  { %1055 = vrot.lane.b32.xlu1 %v3350_v6, %s3450_s16 }
 0xcae   :  { %v3352_v7 = vpop.eup %3351 }
 0xcaf   :  { %v1049_v52 = vadd.f32 1.0, %v3352_v7 }
 0xcb1   :  { %3353 = vrcp.f32 %v1049_v52 }
 0xcbb   :  { %v3354_v8 = vpop.eup %3353 }
 0xcbc   :  { %1053 = vrot.lane.b32.xlu0 %v3354_v8, %s3449_s15 }
 0xcc0   :  { %1057 = vrot.lane.b32.xlu0 %v3354_v8, %s3448_s3 }
 0xd1f   :  { %v1056_v10 = vpop.permute.xlu1 %1055 }
 0xd20   :  { %v1060_v13 = vmul.f32 %v3354_v8, %v1056_v10 }
 0xd2e   :  { %v1054_v12 = vpop.permute.xlu0 %1053 }
 0xd2f   :  { %v1059_v14 = vmul.f32 0.0, %v1054_v12 }
 0xd31   :  { %v1061_v15 = vadd.f32 %v1060_v13, %v1059_v14 }
 0xd32   :  { %v1058_v19 = vpop.permute.xlu0 %1057 }
 0xd33   :  { %3355 = vtanh.f32 %v1061_v15 }
 0xd3d   :  { %v3356_v18 = vpop.eup %3355 }
 0xd3e   :  { %v3978_v20 = vmul.f32 %v3356_v18, %v1058_v19 }
 0xd40   :  { %2626 = vmatmul.mubr.f32.vlgmr.msra.gmra.mrb[18].mxu1 %v3978_v20 }
 0xd41   :  { %3152 = vmatpush3.bf16.msra.mxu1 %v3804_v4  ;;  %2695 = vmatprep.mubr.msk.f32.mxu1 %vm3446_vm0, %v3447_v2 }
 0xd42   :  { %3153 = vmatprep.subr.bf16.mxu1 %v3445_v1 }
 0xd45   :  { %3155 = vmatpush3.bf16.msra.mxu1 %v3820_v9 }
 0xd46   :  { %3156 = vmatprep.subr.bf16.mxu1 %v3445_v1 }
 0xd49   :  { %3158 = vmatpush3.bf16.msra.mxu1 %v3837_v17 }
 0xd4a   :  { %3159 = vmatprep.subr.bf16.mxu1 %v3445_v1 }
 0xd4d   :  { %3161 = vmatpush3.bf16.msra.mxu1 %v3854_v22 }
 0xd4e   :  { %3162 = vmatprep.subr.bf16.mxu1 %v3445_v1 }
 0xd51   :  { %3164 = vmatpush3.bf16.msra.mxu1 %v3873_v27 }
 0xd52   :  { %3165 = vmatprep.subr.bf16.mxu1 %v3445_v1 }
 0xd55   :  { %3167 = vmatpush3.bf16.msra.mxu1 %v3890_v54 }
 0xd56   :  { %3168 = vmatprep.subr.bf16.mxu1 %v3445_v1 }
 0xd59   :  { %3170 = vmatpush3.bf16.msra.mxu1 %v3907_v40 }
 0xd5a   :  { %3171 = vmatprep.subr.bf16.mxu1 %v3445_v1 }
 0xd5d   :  { %3173 = vmatpush3.bf16.msra.mxu1 %v3925_v49 }
 0xd5e   :  { %3198 = vmatprep.subr.bf16.mxu1 %v3445_v1 }
 0xe13   :  { %v1130_v21 = vpop.f32.mrb[18].mxu1 }
 0xe14   :  { %v1134_v50 = vadd.f32 %v1130_v21, %v3972_v0  ;;  %v2627_v24 = vpop.f32.mrb[19].mxu1 }
 0xe16   :  { %v1903_v25 = vmul.f32 -1.442695, %v1134_v50  ;;  %3357 = vtanh.f32 %v1134_v50 }
 0xe18   :  { %3359 = vpow2.f32 %v1903_v25 }
 0xe20   :  { %v3358_v11 = vpop.eup %3357 }
 0xe21   :  { %1144 = vrot.lane.b32.xlu0 %v3358_v11, %s3450_s16 }
 0xe22   :  { %v3360_v16 = vpop.eup %3359 }
 0xe23   :  { %v1138_v23 = vadd.f32 1.0, %v3360_v16 }
 0xe25   :  { %3361 = vrcp.f32 %v1138_v23 }
 0xe2f   :  { %v3362_v26 = vpop.eup %3361 }
 0xe30   :  { %1142 = vrot.lane.b32.xlu1 %v3362_v26, %s3449_s15 }
 0xe34   :  { %1146 = vrot.lane.b32.xlu1 %v3362_v26, %s3448_s3 }
 0xe93   :  { %v1145_v29 = vpop.permute.xlu0 %1144 }
 0xe94   :  { %v1149_v35 = vmul.f32 %v3362_v26, %v1145_v29 }
 0xea2   :  { %v1143_v32 = vpop.permute.xlu1 %1142 }
 0xea3   :  { %v1148_v38 = vmul.f32 %v1143_v32, %v1061_v15 }
 0xea5   :  { %v1150_v28 = vadd.f32 %v1149_v35, %v1148_v38 }
 0xea6   :  { %v1147_v31 = vpop.permute.xlu1 %1146 }
 0xea7   :  { %3363 = vtanh.f32 %v1150_v28 }
 0xeb1   :  { %v3364_v30 = vpop.eup %3363 }
 0xeb2   :  { %v4003_v33 = vmul.f32 %v3364_v30, %v1147_v31 }
 0xeb4   :  { %2661 = vmatmul.mubr.f32.vlgmr.msra.gmra.mrb[10].mxu0 %v4003_v33 }
 0xeb5   :  { %3176 = vmatpush3.bf16.msra.mxu0 %v3804_v4  ;;  %2730 = vmatprep.mubr.msk.f32.mxu0 %vm3446_vm0, %v3447_v2 }
 0xeb6   :  { %3177 = vmatprep.subr.bf16.mxu0 %v3445_v1 }
 0xeb9   :  { %3179 = vmatpush3.bf16.msra.mxu0 %v3820_v9 }
 0xeba   :  { %3180 = vmatprep.subr.bf16.mxu0 %v3445_v1 }
 0xebd   :  { %3182 = vmatpush3.bf16.msra.mxu0 %v3837_v17 }
 0xebe   :  { %3183 = vmatprep.subr.bf16.mxu0 %v3445_v1 }
 0xec1   :  { %3185 = vmatpush3.bf16.msra.mxu0 %v3854_v22 }
 0xec2   :  { %3186 = vmatprep.subr.bf16.mxu0 %v3445_v1 }
 0xec5   :  { %3188 = vmatpush3.bf16.msra.mxu0 %v3873_v27 }
 0xec6   :  { %3189 = vmatprep.subr.bf16.mxu0 %v3445_v1 }
 0xec9   :  { %3191 = vmatpush3.bf16.msra.mxu0 %v3890_v54 }
 0xeca   :  { %3192 = vmatprep.subr.bf16.mxu0 %v3445_v1 }
 0xecd   :  { %3194 = vmatpush3.bf16.msra.mxu0 %v3907_v40 }
 0xece   :  { %3195 = vmatprep.subr.bf16.mxu0 %v3445_v1 }
 0xed1   :  { %3197 = vmatpush3.bf16.msra.mxu0 %v3925_v49 }
 0xed2   :  { %3222 = vmatprep.subr.bf16.mxu0 %v3445_v1 }
 0xf87   :  { %v1219_v34 = vpop.f32.mrb[10].mxu0 }
 0xf88   :  { %v1223_v36 = vadd.f32 %v1219_v34, %v3972_v0  ;;  %v2662_v37 = vpop.f32.mrb[11].mxu0 }
 0xf8a   :  { %v1904_v39 = vmul.f32 -1.442695, %v1223_v36  ;;  %3365 = vtanh.f32 %v1223_v36 }
 0xf8c   :  { %3367 = vpow2.f32 %v1904_v39 }
 0xf94   :  { %v3366_v42 = vpop.eup %3365 }
 0xf95   :  { %1233 = vrot.lane.b32.xlu1 %v3366_v42, %s3450_s16  ;;  %v3278_v42 = vld [vmem:[%s4186_s7 + $0x8] sm:$0xff]  }
 0xf96   :  { %v3368_v43 = vpop.eup %3367 }
 0xf97   :  { %v1227_v45 = vadd.f32 1.0, %v3368_v43  ;;  %v1687_v43 = vpack.c.bf16 %v4003_v33, %v3978_v20  ;;  %v3281_v20 = vld [vmem:[%s4186_s7 + $0x20] sm:$0xff]   ;;  %v3282_v33 = vld [vmem:[%s4186_s7 + $0x28] sm:$0xff]  }
 0xf99   :  { %3369 = vrcp.f32 %v1227_v45  ;;  %v3279_v45 = vld [vmem:[%s4186_s7 + $0x10] sm:$0xff]  }
 0xfa3   :  { %v3370_v46 = vpop.eup %3369 }
 0xfa4   :  { %1231 = vrot.lane.b32.xlu0 %v3370_v46, %s3449_s15 }
 0xfa8   :  { %1235 = vrot.lane.b32.xlu0 %v3370_v46, %s3448_s3 }
0x1007   :  { %v1234_v47 = vpop.permute.xlu1 %1233 }
0x1008   :  { %v1238_v51 = vmul.f32 %v3370_v46, %v1234_v47  ;;  %v3280_v46 = vld [vmem:[%s4186_s7 + $0x18] sm:$0xff]   ;;  %v3283_v47 = vld [vmem:[%s4186_s7 + $0x30] sm:$0xff]  }
0x1016   :  { %v1232_v41 = vpop.permute.xlu0 %1231 }
0x1017   :  { %v1237_v53 = vmul.f32 %v1232_v41, %v1150_v28  ;;  %v3284_v41 = vld [vmem:[%s4186_s7 + $0x38] sm:$0xff]  }
0x1019   :  { %v1239_v55 = vadd.f32 %v1238_v51, %v1237_v53 }
0x101a   :  { %v1236_v57 = vpop.permute.xlu0 %1235 }
0x101b   :  { %3371 = vtanh.f32 %v1239_v55 }
0x1025   :  { %v3372_v56 = vpop.eup %3371 }
0x1026   :  { %v4028_v58 = vmul.f32 %v3372_v56, %v1236_v57 }
0x1028   :  { %2696 = vmatmul.mubr.f32.vlgmr.msra.gmra.mrb[20].mxu1 %v4028_v58 }
0x1029   :  { %3200 = vmatpush3.bf16.msra.mxu1 %v3804_v4  ;;  %2765 = vmatprep.mubr.msk.f32.mxu1 %vm3446_vm0, %v3447_v2 }
0x102a   :  { %3201 = vmatprep.subr.bf16.mxu1 %v3445_v1 }
0x102d   :  { %3203 = vmatpush3.bf16.msra.mxu1 %v3820_v9 }
0x102e   :  { %3204 = vmatprep.subr.bf16.mxu1 %v3445_v1 }
0x1031   :  { %3206 = vmatpush3.bf16.msra.mxu1 %v3837_v17 }
0x1032   :  { %3207 = vmatprep.subr.bf16.mxu1 %v3445_v1 }
0x1035   :  { %3209 = vmatpush3.bf16.msra.mxu1 %v3854_v22 }
0x1036   :  { %3210 = vmatprep.subr.bf16.mxu1 %v3445_v1 }
0x1039   :  { %3212 = vmatpush3.bf16.msra.mxu1 %v3873_v27 }
0x103a   :  { %3213 = vmatprep.subr.bf16.mxu1 %v3445_v1 }
0x103d   :  { %3215 = vmatpush3.bf16.msra.mxu1 %v3890_v54 }
0x103e   :  { %3216 = vmatprep.subr.bf16.mxu1 %v3445_v1 }
0x1041   :  { %3218 = vmatpush3.bf16.msra.mxu1 %v3907_v40 }
0x1042   :  { %3219 = vmatprep.subr.bf16.mxu1 %v3445_v1 }
0x1045   :  { %3221 = vmatpush3.bf16.msra.mxu1 %v3925_v49 }
0x1046   :  { %3246 = vmatprep.subr.bf16.mxu1 %v3445_v1 }
0x10fb   :  { %v1308_v59 = vpop.f32.mrb[20].mxu1 }
0x10fc   :  { %v1312_v60 = vadd.f32 %v1308_v59, %v3972_v0  ;;  %v2697_v48 = vpop.f32.mrb[21].mxu1 }
0x10fe   :  { %v1905_v61 = vmul.f32 -1.442695, %v1312_v60  ;;  %3373 = vtanh.f32 %v1312_v60 }
0x1100   :  { %3375 = vpow2.f32 %v1905_v61 }
0x1108   :  { %v3374_v62 = vpop.eup %3373 }
0x1109   :  { %1322 = vrot.lane.b32.xlu0 %v3374_v62, %s3450_s16 }
0x110a   :  { %v3376_v63 = vpop.eup %3375 }
0x110b   :  { %v1316_v3 = vadd.f32 1.0, %v3376_v63 }
0x110d   :  { %3377 = vrcp.f32 %v1316_v3 }
0x1117   :  { %v3378_v44 = vpop.eup %3377 }
0x1118   :  { %1320 = vrot.lane.b32.xlu1 %v3378_v44, %s3449_s15 }
0x111c   :  { %1324 = vrot.lane.b32.xlu1 %v3378_v44, %s3448_s3 }
0x117b   :  { %v1323_v5 = vpop.permute.xlu0 %1322 }
0x117c   :  { %v1327_v7 = vmul.f32 %v3378_v44, %v1323_v5 }
0x118a   :  { %v1321_v6 = vpop.permute.xlu1 %1320 }
0x118b   :  { %v1326_v52 = vmul.f32 %v1321_v6, %v1239_v55 }
0x118d   :  { %v1328_v8 = vadd.f32 %v1327_v7, %v1326_v52 }
0x118e   :  { %v1325_v12 = vpop.permute.xlu1 %1324 }
0x118f   :  { %3379 = vtanh.f32 %v1328_v8 }
0x1199   :  { %v3380_v10 = vpop.eup %3379 }
0x119a   :  { %v4053_v13 = vmul.f32 %v3380_v10, %v1325_v12 }
0x119c   :  { %2731 = vmatmul.mubr.f32.vlgmr.msra.gmra.mrb[12].mxu0 %v4053_v13  ;;  %v1688_v51 = vpack.c.bf16 %v4053_v13, %v4028_v58  ;;  %v4139_v58 = vld [vmem:[%s4187_s8] ss:$0 sm:$0xff] }
0x119d   :  { %3224 = vmatpush3.bf16.msra.mxu0 %v3804_v4  ;;  %2800 = vmatprep.mubr.msk.f32.mxu0 %vm3446_vm0, %v3447_v2 }
0x119e   :  { %3225 = vmatprep.subr.bf16.mxu0 %v3445_v1 }
0x11a1   :  { %3227 = vmatpush3.bf16.msra.mxu0 %v3820_v9 }
0x11a2   :  { %3228 = vmatprep.subr.bf16.mxu0 %v3445_v1 }
0x11a5   :  { %3230 = vmatpush3.bf16.msra.mxu0 %v3837_v17 }
0x11a6   :  { %3231 = vmatprep.subr.bf16.mxu0 %v3445_v1 }
0x11a9   :  { %3233 = vmatpush3.bf16.msra.mxu0 %v3854_v22 }
0x11aa   :  { %3234 = vmatprep.subr.bf16.mxu0 %v3445_v1 }
0x11ad   :  { %3236 = vmatpush3.bf16.msra.mxu0 %v3873_v27 }
0x11ae   :  { %3237 = vmatprep.subr.bf16.mxu0 %v3445_v1 }
0x11b1   :  { %3239 = vmatpush3.bf16.msra.mxu0 %v3890_v54 }
0x11b2   :  { %3240 = vmatprep.subr.bf16.mxu0 %v3445_v1 }
0x11b5   :  { %3242 = vmatpush3.bf16.msra.mxu0 %v3907_v40 }
0x11b6   :  { %3243 = vmatprep.subr.bf16.mxu0 %v3445_v1 }
0x11b9   :  { %3245 = vmatpush3.bf16.msra.mxu0 %v3925_v49 }
0x126f   :  { %v1397_v14 = vpop.f32.mrb[12].mxu0 }
0x1270   :  { %v1401_v15 = vadd.f32 %v1397_v14, %v3972_v0  ;;  %v2732_v18 = vpop.f32.mrb[13].mxu0 }
0x1272   :  { %v1906_v19 = vmul.f32 -1.442695, %v1401_v15  ;;  %3381 = vtanh.f32 %v1401_v15 }
0x1274   :  { %3383 = vpow2.f32 %v1906_v19 }
0x127c   :  { %v3382_v21 = vpop.eup %3381 }
0x127d   :  { %1411 = vrot.lane.b32.xlu1 %v3382_v21, %s3450_s16 }
0x127e   :  { %v3384_v50 = vpop.eup %3383 }
0x127f   :  { %v1405_v24 = vadd.f32 1.0, %v3384_v50 }
0x1281   :  { %3385 = vrcp.f32 %v1405_v24 }
0x128b   :  { %v3386_v25 = vpop.eup %3385 }
0x128c   :  { %1409 = vrot.lane.b32.xlu0 %v3386_v25, %s3449_s15 }
0x1290   :  { %1413 = vrot.lane.b32.xlu0 %v3386_v25, %s3448_s3 }
0x12ef   :  { %v1412_v11 = vpop.permute.xlu1 %1411 }
0x12f0   :  { %v1416_v23 = vmul.f32 %v3386_v25, %v1412_v11 }
0x12fe   :  { %v1410_v16 = vpop.permute.xlu0 %1409 }
0x12ff   :  { %v1415_v26 = vmul.f32 %v1410_v16, %v1328_v8 }
0x1301   :  { %v1417_v29 = vadd.f32 %v1416_v23, %v1415_v26 }
0x1302   :  { %v1414_v35 = vpop.permute.xlu0 %1413 }
0x1303   :  { %3387 = vtanh.f32 %v1417_v29 }
0x130d   :  { %v3388_v32 = vpop.eup %3387 }
0x130e   :  { %v4077_v38 = vmul.f32 %v3388_v32, %v1414_v35 }
0x1310   :  { %2766 = vmatmul.mubr.f32.vlgmr.msra.gmra.mrb[22].mxu1 %v4077_v38 }
0x1311   :  { %3248 = vmatpush3.bf16.msra.mxu1 %v3804_v4  ;;  %2835 = vmatprep.mubr.msk.f32.mxu1 %vm3446_vm0, %v3447_v2 }
0x1312   :  { %3249 = vmatprep.subr.bf16.mxu1 %v3445_v1 }
0x1315   :  { %3251 = vmatpush3.bf16.msra.mxu1 %v3820_v9 }
0x1316   :  { %3252 = vmatprep.subr.bf16.mxu1 %v3445_v1 }
0x1319   :  { %3254 = vmatpush3.bf16.msra.mxu1 %v3837_v17 }
0x131a   :  { %3255 = vmatprep.subr.bf16.mxu1 %v3445_v1 }
0x131d   :  { %3257 = vmatpush3.bf16.msra.mxu1 %v3854_v22 }
0x131e   :  { %3258 = vmatprep.subr.bf16.mxu1 %v3445_v1 }
0x1321   :  { %3260 = vmatpush3.bf16.msra.mxu1 %v3873_v27 }
0x1322   :  { %3261 = vmatprep.subr.bf16.mxu1 %v3445_v1 }
0x1325   :  { %3263 = vmatpush3.bf16.msra.mxu1 %v3890_v54 }
0x1326   :  { %3264 = vmatprep.subr.bf16.mxu1 %v3445_v1 }
0x1329   :  { %3266 = vmatpush3.bf16.msra.mxu1 %v3907_v40 }
0x132a   :  { %3267 = vmatprep.subr.bf16.mxu1 %v3445_v1  ;;  %v3277_v1 = vld [vmem:[%s4186_s7] sm:$0xff]  }
0x132b   :  { %2838 = vmatprep.subr.bf16.mxu0 %v3277_v1 }
0x132d   :  { %3269 = vmatpush3.bf16.msra.mxu1 %v3925_v49 }
0x13e3   :  { %v1486_v2 = vpop.f32.mrb[22].mxu1 }
0x13e4   :  { %v1490_v4 = vadd.f32 %v1486_v2, %v3972_v0  ;;  %v2767_v9 = vpop.f32.mrb[23].mxu1 }
0x13e6   :  { %v1907_v17 = vmul.f32 -1.442695, %v1490_v4  ;;  %3389 = vtanh.f32 %v1490_v4 }
0x13e8   :  { %3391 = vpow2.f32 %v1907_v17 }
0x13f0   :  { %v3390_v22 = vpop.eup %3389 }
0x13f1   :  { %1500 = vrot.lane.b32.xlu0 %v3390_v22, %s3450_s16 }
0x13f2   :  { %v3392_v27 = vpop.eup %3391 }
0x13f3   :  { %v1494_v54 = vadd.f32 1.0, %v3392_v27 }
0x13f5   :  { %3393 = vrcp.f32 %v1494_v54 }
0x13ff   :  { %v3394_v28 = vpop.eup %3393 }
0x1400   :  { %1498 = vrot.lane.b32.xlu1 %v3394_v28, %s3449_s15 }
0x1404   :  { %1502 = vrot.lane.b32.xlu1 %v3394_v28, %s3448_s3 }
0x1463   :  { %v1501_v40 = vpop.permute.xlu0 %1500 }
0x1464   :  { %v1505_v30 = vmul.f32 %v3394_v28, %v1501_v40 }
0x1472   :  { %v1499_v49 = vpop.permute.xlu1 %1498 }
0x1473   :  { %v1504_v31 = vmul.f32 %v1499_v49, %v1417_v29 }
0x1475   :  { %v4104_v34 = vadd.f32 %v1505_v30, %v1504_v31 }
0x1476   :  { %v1503_v37 = vpop.permute.xlu1 %1502 }
0x1477   :  { %3395 = vtanh.f32 %v4104_v34 }
0x1481   :  { %v3396_v36 = vpop.eup %3395 }
0x1482   :  { %v1508_v39 = vmul.f32 %v3396_v36, %v1503_v37 }
0x1484   :  { %2801 = vmatmul.mubr.f32.vlgmr.msra.gmra.mrb[14].mxu0 %v1508_v39  ;;  %v1689_v53 = vpack.c.bf16 %v1508_v39, %v4077_v38 }
0x1485   :  { %2839 = vmatpush3.bf16.msra.mxu0 %v3277_v1  ;;  %2854 = vmatprep.mubr.bf16.mxu0 %v1687_v43 }
0x1486   :  { %2840 = vmatprep.subr.bf16.mxu0 %v3278_v42 }
0x1489   :  { %2841 = vmatpush3.bf16.msra.mxu0 %v3278_v42 }
0x148a   :  { %2842 = vmatprep.subr.bf16.mxu0 %v3279_v45 }
0x148d   :  { %2843 = vmatpush3.bf16.msra.mxu0 %v3279_v45 }
0x148e   :  { %2844 = vmatprep.subr.bf16.mxu0 %v3280_v46 }
0x1491   :  { %2845 = vmatpush3.bf16.msra.mxu0 %v3280_v46 }
0x1492   :  { %2846 = vmatprep.subr.bf16.mxu0 %v3281_v20 }
0x1495   :  { %2847 = vmatpush3.bf16.msra.mxu0 %v3281_v20 }
0x1496   :  { %2848 = vmatprep.subr.bf16.mxu0 %v3282_v33 }
0x1499   :  { %2849 = vmatpush3.bf16.msra.mxu0 %v3282_v33 }
0x149a   :  { %2850 = vmatprep.subr.bf16.mxu0 %v3283_v47 }
0x149d   :  { %2851 = vmatpush3.bf16.msra.mxu0 %v3283_v47 }
0x149e   :  { %2852 = vmatprep.subr.bf16.mxu0 %v3284_v41 }
0x14a1   :  { %2853 = vmatpush3.bf16.msra.mxu0 %v3284_v41 }
0x14a4   :  { %2855 = vmatmul.mubr.bf16.vlgmr.msra.gmra.mrb[16].mxu0 %v1688_v51 }
0x14a5   :  { %2858 = vmatprep.mubr.bf16.mxu0 %v1689_v53 }
0x1557   :  { %v1575_v55 = vpop.f32.mrb[14].mxu0 }
0x1558   :  { %v1579_v56 = vadd.f32 %v1575_v55, %v3972_v0  ;;  %v2802_v57 = vpop.f32.mrb[15].mxu0 }
0x155a   :  { %v1908_v59 = vmul.f32 -1.442695, %v1579_v56  ;;  %3397 = vtanh.f32 %v1579_v56 }
0x155c   :  { %3399 = vpow2.f32 %v1908_v59 }
0x1564   :  { %v3398_v60 = vpop.eup %3397 }
0x1565   :  { %1589 = vrot.lane.b32.xlu1 %v3398_v60, %s3450_s16 }
0x1566   :  { %v3400_v48 = vpop.eup %3399 }
0x1567   :  { %v1583_v61 = vadd.f32 1.0, %v3400_v48 }
0x1569   :  { %3401 = vrcp.f32 %v1583_v61 }
0x1573   :  { %v3402_v62 = vpop.eup %3401 }
0x1574   :  { %1587 = vrot.lane.b32.xlu0 %v3402_v62, %s3449_s15 }
0x1577   :  { %v2856_v63 = vpop.f32.mrb[16].mxu0 }
0x1578   :  { %v1805_v3 = vadd.f32 %v2856_v63, %v4139_v58  ;;  %v1796_v44 = vpop.f32.mrb[17].mxu0  ;;  %1591 = vrot.lane.b32.xlu0 %v3402_v62, %s3448_s3 }
0x1579   :  { %v1797_v5 = vadd.f32 %v4139_v58, %v1796_v44  ;;  %v2857_v6 = vpop.f32.mrb[18].mxu0 }
0x157a   :  { %v1921_v7 = vmul.f32 -1.442695, %v1805_v3  ;;  %v1808_v52 = vadd.f32 %v2857_v6, %v4139_v58  ;;  %v1799_v8 = vpop.f32.mrb[19].mxu0 }
0x157b   :  { %v1919_v10 = vmul.f32 -1.442695, %v1797_v5  ;;  %v1800_v12 = vadd.f32 %v4139_v58, %v1799_v8 }
0x157c   :  { %3403 = vpow2.f32 %v1921_v7  ;;  %v1922_v13 = vmul.f32 -1.442695, %v1808_v52 }
0x157d   :  { %3405 = vpow2.f32 %v1919_v10  ;;  %v1920_v14 = vmul.f32 -1.442695, %v1800_v12 }
0x157e   :  { %3407 = vpow2.f32 %v1922_v13 }
0x157f   :  { %3409 = vpow2.f32 %v1920_v14 }
0x1586   :  { %v3404_v15 = vpop.eup %3403 }
0x1587   :  { %v3406_v18 = vpop.eup %3405  ;;  %v1853_v19 = vadd.f32 1.0, %v3404_v15 }
0x1588   :  { %v3408_v21 = vpop.eup %3407  ;;  %v1851_v50 = vadd.f32 1.0, %v3406_v18 }
0x1589   :  { %v3410_v24 = vpop.eup %3409  ;;  %3411 = vrcp.f32 %v1853_v19  ;;  %v1854_v25 = vadd.f32 1.0, %v3408_v21 }
0x158a   :  { %3413 = vrcp.f32 %v1851_v50  ;;  %v1852_v11 = vadd.f32 1.0, %v3410_v24 }
0x158b   :  { %3415 = vrcp.f32 %v1854_v25 }
0x158c   :  { %3417 = vrcp.f32 %v1852_v11 }
0x1593   :  { %v3412_v16 = vpop.eup %3411 }
0x1594   :  { %v3414_v23 = vpop.eup %3413  ;;  %1877 = vst [vmem:[%s4188_s9 + $0x10] sm:$0xff] %v3412_v16 }
0x1595   :  { %v3416_v26 = vpop.eup %3415  ;;  %1875 = vst [vmem:[%s4188_s9] sm:$0xff] %v3414_v23 }
0x1596   :  { %v3418_v29 = vpop.eup %3417  ;;  %1878 = vst [vmem:[%s4188_s9 + $0x18] sm:$0xff] %v3416_v26 }
0x1597   :  { %1876 = vst [vmem:[%s4188_s9 + $0x8] sm:$0xff] %v3418_v29 }
0x15d7   :  { %v1590_v32 = vpop.permute.xlu1 %1589 }
0x15d8   :  { %v1594_v38 = vmul.f32 %v3402_v62, %v1590_v32 }
0x15e6   :  { %v1588_v35 = vpop.permute.xlu0 %1587 }
0x15e7   :  { %v1593_v2 = vmul.f32 %v1588_v35, %v4104_v34 }
0x15e9   :  { %v1595_v4 = vadd.f32 %v1594_v38, %v1593_v2 }
0x15ea   :  { %v1592_v17 = vpop.permute.xlu0 %1591 }
0x15eb   :  { %3419 = vtanh.f32 %v1595_v4 }
0x15f5   :  { %v3420_v9 = vpop.eup %3419 }
0x15f6   :  { %v1597_v22 = vmul.f32 %v3420_v9, %v1592_v17 }
0x15f8   :  { %2836 = vmatmul.mubr.f32.vlgmr.msra.gmra.mrb[24].mxu1 %v1597_v22 }
0x16cb   :  { %v1664_v27 = vpop.f32.mrb[24].mxu1 }
0x16cc   :  { %v1668_v54 = vadd.f32 %v1664_v27, %v3972_v0  ;;  %v2837_v28 = vpop.f32.mrb[25].mxu1 }
0x16ce   :  { %v1909_v1 = vmul.f32 -1.442695, %v1668_v54  ;;  %3421 = vtanh.f32 %v1668_v54 }
0x16d0   :  { %3423 = vpow2.f32 %v1909_v1 }
0x16d8   :  { %v3422_v40 = vpop.eup %3421 }
0x16d9   :  { %1678 = vrot.lane.b32.xlu0 %v3422_v40, %s3450_s16 }
0x16da   :  { %v3424_v49 = vpop.eup %3423 }
0x16db   :  { %v1672_v30 = vadd.f32 1.0, %v3424_v49 }
0x16dd   :  { %3425 = vrcp.f32 %v1672_v30 }
0x16e7   :  { %v3426_v31 = vpop.eup %3425 }
0x16e8   :  { %1676 = vrot.lane.b32.xlu1 %v3426_v31, %s3449_s15 }
0x16ec   :  { %1680 = vrot.lane.b32.xlu1 %v3426_v31, %s3448_s3 }
0x174b   :  { %v1679_v34 = vpop.permute.xlu0 %1678 }
0x174c   :  { %v1683_v37 = vmul.f32 %v3426_v31, %v1679_v34 }
0x175a   :  { %v1677_v36 = vpop.permute.xlu1 %1676 }
0x175b   :  { %v1682_v39 = vmul.f32 %v1677_v36, %v1595_v4 }
0x175d   :  { %v1684_v0 = vadd.f32 %v1683_v37, %v1682_v39 }
0x175e   :  { %v1681_v43 = vpop.permute.xlu1 %1680 }
0x175f   :  { %3427 = vtanh.f32 %v1684_v0 }
0x1769   :  { %v3428_v42 = vpop.eup %3427 }
0x176a   :  { %v1686_v45 = vmul.f32 %v3428_v42, %v1681_v43 }
0x176c   :  { %v1690_v46 = vpack.c.bf16 %v1686_v45, %v1597_v22 }
0x176e   :  { %2859 = vmatmul.mubr.bf16.gmra.mrb[20].mxu0 %v1690_v46 }
0x1841   :  { %v2860_v20 = vpop.f32.mrb[20].mxu0 }
0x1842   :  { %v1821_v33 = vadd.f32 %v2860_v20, %v4139_v58  ;;  %v1812_v47 = vpop.f32.mrb[21].mxu0 }
0x1843   :  { %v1813_v41 = vadd.f32 %v4139_v58, %v1812_v47  ;;  %v2861_v51 = vpop.f32.mrb[22].mxu0 }
0x1844   :  { %v1925_v53 = vmul.f32 -1.442695, %v1821_v33  ;;  %v1824_v55 = vadd.f32 %v2861_v51, %v4139_v58  ;;  %v1815_v56 = vpop.f32.mrb[23].mxu0 }
0x1845   :  { %v1923_v57 = vmul.f32 -1.442695, %v1813_v41  ;;  %v1816_v59 = vadd.f32 %v4139_v58, %v1815_v56 }
0x1846   :  { %3429 = vpow2.f32 %v1925_v53  ;;  %v1926_v60 = vmul.f32 -1.442695, %v1824_v55 }
0x1847   :  { %3431 = vpow2.f32 %v1923_v57  ;;  %v1924_v48 = vmul.f32 -1.442695, %v1816_v59 }
0x1848   :  { %3433 = vpow2.f32 %v1926_v60 }
0x1849   :  { %3435 = vpow2.f32 %v1924_v48 }
0x1850   :  { %v3430_v61 = vpop.eup %3429 }
0x1851   :  { %v3432_v62 = vpop.eup %3431  ;;  %v1857_v63 = vadd.f32 1.0, %v3430_v61 }
0x1852   :  { %v3434_v3 = vpop.eup %3433  ;;  %v1855_v44 = vadd.f32 1.0, %v3432_v62 }
0x1853   :  { %v3436_v5 = vpop.eup %3435  ;;  %3437 = vrcp.f32 %v1857_v63  ;;  %v1858_v6 = vadd.f32 1.0, %v3434_v3 }
0x1854   :  { %3439 = vrcp.f32 %v1855_v44  ;;  %v1856_v7 = vadd.f32 1.0, %v3436_v5 }
0x1855   :  { %3441 = vrcp.f32 %v1858_v6 }
0x1856   :  { %3443 = vrcp.f32 %v1856_v7 }
0x185d   :  { %v3438_v52 = vpop.eup %3437 }
0x185e   :  { %v3440_v58 = vpop.eup %3439  ;;  %1881 = vst [vmem:[%s4188_s9 + $0x30] sm:$0xff] %v3438_v52 }
0x185f   :  { %v3442_v8 = vpop.eup %3441  ;;  %1879 = vst [vmem:[%s4188_s9 + $0x20] sm:$0xff] %v3440_v58 }
0x1860   :  { %v3444_v10 = vpop.eup %3443  ;;  %1882 = vst [vmem:[%s4188_s9 + $0x38] sm:$0xff] %v3442_v8 }
0x1861   :  { %1880 = vst [vmem:[%s4188_s9 + $0x28] sm:$0xff] %v3444_v10 }

</bundles_post_ra>
